<compile_context>
chip_gen: v7x
topology: tpu7x:2x2x1
jax: 0.10.0
libtpu: 0.0.40
codegen_flags: <defaults>
</compile_context>

<pallas_src>
import jax
import jax.numpy as jnp
from jax.experimental import pallas as pl
from jax.experimental.pallas import tpu as pltpu

LANE = 128  # TPU lane width; every gate occupies one full lane slot.


# ----------------------------------------------------------------------------
# Pallas kernel: full GRU recurrence (PyTorch nn.GRU gate order [r | z | n],
# single layer, batch=1) in one invocation.
# ----------------------------------------------------------------------------
def encoder_gru_kernel(x_ref, wih_ref, whh_ref, bi_ref, bhn_ref, h0_ref,
                       out_ref):
    """x_ref   : (T, HP)     bf16  pre-gathered token embeddings
       wih_ref : (HP, 3*HP)  bf16  transposed, lane-padded input weights
       whh_ref : (HP, 3*HP)  bf16  transposed, lane-padded hidden weights
       bi_ref  : (1, 3*HP)   f32   r/z: b_ih+b_hh pre-summed; n: b_ih only
       bhn_ref : (1, HP)     f32   hidden-side n-gate bias
       h0_ref  : (1, HP)     f32   initial hidden state (zero-padded lanes)
       out_ref : (T, HP)     f32   per-token hidden states"""
    HP = h0_ref.shape[-1]
    T = x_ref.shape[0]

    # Input projection for ALL tokens at once: one real MXU matmul, off the
    # serial dependence chain.  Biases folded in here.
    gi = jnp.dot(x_ref[...], wih_ref[...],
                 preferred_element_type=jnp.float32) + bi_ref[...]  # (T, 3*HP)

    whh = whh_ref[...]          # (HP, 3*HP) bf16, loaded once, VMEM-resident
    bhn = bhn_ref[...]          # (1, HP)
    h = h0_ref[...]             # (1, HP) f32, stays register-resident

    hs = []
    # T is a small compile-time constant: fully unroll so the scheduler can
    # overlap each step's VPU epilogue with the next step's MXU push.
    # TODO(synk): for very long sequences, chunk the time axis with a grid and
    # carry the hidden state in a VMEM scratch across chunks.
    for t in range(T):
        gh = jnp.dot(h.astype(jnp.bfloat16), whh,
                     preferred_element_type=jnp.float32)            # (1, 3*HP)
        gi_t = gi[t:t + 1, :]                                       # static slice
        # Gates sit at lane-aligned offsets 0 / HP / 2*HP -> pure slicing.
        rz = jax.nn.sigmoid(gi_t[:, :2 * HP] + gh[:, :2 * HP])
        r, z = rz[:, :HP], rz[:, HP:]
        n = jnp.tanh(gi_t[:, 2 * HP:] + r * (gh[:, 2 * HP:] + bhn))
        h = (1.0 - z) * n + z * h
        hs.append(h)

    out_ref[...] = jnp.concatenate(hs, axis=0)   # one lane-dense (T, HP) store


# ----------------------------------------------------------------------------
# Wrapper: one pallas_call for the whole sequence.
# ----------------------------------------------------------------------------
def encoder_gru_sequence(params, token_ids, hidden0):
    """token_ids: (T,) int32; hidden0: (1, 1, H).
    Returns (outputs (T, 1, H), hidden (1, 1, H))."""
    H = hidden0.shape[-1]
    HP = params["w_ih_t"].shape[0]
    T = token_ids.shape[0]

    # Coalesced embedding gather outside the kernel: one (T, HP) bf16 slab.
    x = jnp.take(params["embedding_padded"], token_ids.astype(jnp.int32),
                 axis=0)

    # Zero-padded lanes in h0 keep the padded hidden lanes at exactly zero
    # for the whole recurrence (padded gates compute z = 0.5, n = 0).
    h0 = jnp.zeros((1, HP), jnp.float32).at[:, :H].set(hidden0.reshape(1, H))

    out = pl.pallas_call(
        encoder_gru_kernel,
        out_shape=jax.ShapeDtypeStruct((T, HP), jnp.float32),
        in_specs=[pl.BlockSpec(memory_space=pltpu.MemorySpace.VMEM)
                  for _ in range(6)],
        out_specs=pl.BlockSpec(memory_space=pltpu.MemorySpace.VMEM),
    )(x, params["w_ih_t"], params["w_hh_t"],
      params["b_i_all"], params["b_hn"], h0)

    outs = out[:, :H]                            # (T, H) strip the lane pad
    outputs = outs.reshape(T, 1, H)              # (seq, batch=1, H)
    hidden = outs[T - 1:T].reshape(1, 1, H)      # final hidden == last output
    return outputs, hidden


def encoder_rnn_forward(params, token_id, hidden):
    """Mirrors EncoderRNN.forward(input, hidden): a single GRU step.
    Returns (output, hidden), each (1, 1, H)."""
    token_ids = jnp.asarray(token_id, jnp.int32).reshape(1)
    return encoder_gru_sequence(params, token_ids, hidden)


def init_hidden(hidden_size):
    return jnp.zeros((1, 1, hidden_size), jnp.float32)


# ----------------------------------------------------------------------------
# Parameters: PyTorch-layout init + packing into the kernel layout.
# ----------------------------------------------------------------------------
def init_encoder_params(key, vocab_size, hidden_size):
    """Deterministic synthetic parameters in PyTorch nn.GRU layout."""
    k_emb, k_wih, k_whh, k_bih, k_bhh = jax.random.split(key, 5)
    bound = 1.0 / jnp.sqrt(hidden_size)
    return {
        "embedding": jax.random.normal(k_emb, (vocab_size, hidden_size),
                                       jnp.float32),
        "w_ih": jax.random.uniform(k_wih, (3 * hidden_size, hidden_size),
                                   jnp.float32, -bound, bound),
        "w_hh": jax.random.uniform(k_whh, (3 * hidden_size, hidden_size),
                                   jnp.float32, -bound, bound),
        "b_ih": jax.random.uniform(k_bih, (3 * hidden_size,),
                                   jnp.float32, -bound, bound),
        "b_hh": jax.random.uniform(k_bhh, (3 * hidden_size,),
                                   jnp.float32, -bound, bound),
    }


def pack_params(raw, hidden_size):
    """Pad/transpose PyTorch-layout params into the lane-aligned kernel layout."""
    H = hidden_size
    HP = max(LANE, ((H + LANE - 1) // LANE) * LANE)
    V = raw["embedding"].shape[0]

    # Padded bf16 embedding table (V, HP); wrapper gathers rows with jnp.take.
    emb = jnp.zeros((V, HP), jnp.float32).at[:, :H].set(raw["embedding"])
    emb = emb.astype(jnp.bfloat16)

    def pack_w(w):  # (3H, H) PyTorch -> (HP, 3*HP) transposed + per-gate padded
        wt = w.T  # (H, 3H)
        out = jnp.zeros((HP, 3 * HP), jnp.float32)
        for g in range(3):
            out = out.at[:H, g * HP:g * HP + H].set(wt[:, g * H:(g + 1) * H])
        return out.astype(jnp.bfloat16)

    b_ih, b_hh = raw["b_ih"], raw["b_hh"]
    # Input-side biases folded into the GI precompute:
    #   r, z slots carry b_ih + b_hh (they are added pre-sigmoid anyway),
    #   n slot carries b_ih only (b_hn must be applied inside r * (.)).
    b_i = jnp.zeros((1, 3 * HP), jnp.float32)
    b_i = b_i.at[0, :H].set(b_ih[:H] + b_hh[:H])                       # r gate
    b_i = b_i.at[0, HP:HP + H].set(b_ih[H:2 * H] + b_hh[H:2 * H])      # z gate
    b_i = b_i.at[0, 2 * HP:2 * HP + H].set(b_ih[2 * H:])               # n (in)
    b_hn = jnp.zeros((1, HP), jnp.float32).at[0, :H].set(b_hh[2 * H:])

    return {
        "embedding_padded": emb,
        "w_ih_t": pack_w(raw["w_ih"]),
        "w_hh_t": pack_w(raw["w_hh"]),
        "b_i_all": b_i,
        "b_hn": b_hn,
    }


# ----------------------------------------------------------------------------
# Pure-JAX reference (PyTorch GRU semantics; inputs/weights rounded to bf16 to
# match the kernel's numerics).
# ----------------------------------------------------------------------------
def encoder_gru_reference(raw, token_ids, hidden0):
    H = hidden0.shape[-1]
    w_ih = raw["w_ih"].astype(jnp.bfloat16).astype(jnp.float32)
    w_hh = raw["w_hh"].astype(jnp.bfloat16).astype(jnp.float32)
    b_ih, b_hh = raw["b_ih"], raw["b_hh"]

    def step(h, tok):
        x = raw["embedding"][tok].reshape(1, H)
        xb = x.astype(jnp.bfloat16).astype(jnp.float32)
        hb = h.astype(jnp.bfloat16).astype(jnp.float32)
        gi = xb @ w_ih.T + b_ih
        gh = hb @ w_hh.T + b_hh
        i_r, i_z, i_n = gi[:, :H], gi[:, H:2 * H], gi[:, 2 * H:]
        h_r, h_z, h_n = gh[:, :H], gh[:, H:2 * H], gh[:, 2 * H:]
        r = jax.nn.sigmoid(i_r + h_r)
        z = jax.nn.sigmoid(i_z + h_z)
        n = jnp.tanh(i_n + r * h_n)
        h_new = (1.0 - z) * n + z * h
        return h_new, h_new

    h_final, outs = jax.lax.scan(step, hidden0.reshape(1, H), token_ids)
    return outs.reshape(-1, 1, H), h_final.reshape(1, 1, H)


if __name__ == "__main__":
    VOCAB = 16
    HIDDEN = 32
    SEQ = 8

    key = jax.random.PRNGKey(0)
    k_params, k_tok = jax.random.split(key)
    raw = init_encoder_params(k_params, VOCAB, HIDDEN)
    params = pack_params(raw, HIDDEN)

    token_ids = jax.random.randint(k_tok, (SEQ,), 0, VOCAB, dtype=jnp.int32)
    hidden0 = init_hidden(HIDDEN)

    # Whole-sequence encoder pass: one gridless pallas_call, all weights and
    # the pre-gathered embedding slab resident in VMEM for the full recurrence.
    outputs, hidden = jax.jit(encoder_gru_sequence)(params, token_ids, hidden0)
    jax.block_until_ready((outputs, hidden))
    assert outputs.shape == (SEQ, 1, HIDDEN)
    assert hidden.shape == (1, 1, HIDDEN)

    # Single-step call mirroring EncoderRNN.forward(input, hidden).
    out1, h1 = encoder_rnn_forward(params, token_ids[0], hidden0)
    jax.block_until_ready((out1, h1))
    assert out1.shape == (1, 1, HIDDEN) and h1.shape == (1, 1, HIDDEN)

    # Numerical check against the pure-JAX PyTorch-semantics reference.
    ref_out, ref_h = encoder_gru_reference(raw, token_ids, hidden0)
    assert jnp.allclose(outputs, ref_out, atol=2e-3, rtol=2e-3)
    assert jnp.allclose(hidden, ref_h, atol=2e-3, rtol=2e-3)
    assert jnp.allclose(out1, ref_out[:1], atol=2e-3, rtol=2e-3)

    print("KERNEL_OK")
</pallas_src>

<mosaic_0001>
module attributes {stable_mosaic.version = 11 : i64} {
  func.func @encoder_gru_kernel(%arg0: memref<8x128xbf16, #tpu.memory_space<vmem>>, %arg1: memref<128x384xbf16, #tpu.memory_space<vmem>>, %arg2: memref<128x384xbf16, #tpu.memory_space<vmem>>, %arg3: memref<1x384xf32, #tpu.memory_space<vmem>>, %arg4: memref<1x128xf32, #tpu.memory_space<vmem>>, %arg5: memref<1x128xf32, #tpu.memory_space<vmem>>, %arg6: memref<8x128xf32, #tpu.memory_space<vmem>>) attributes {dimension_semantics = [], scalar_prefetch = 0 : i64, scratch_operands = 0 : i64, tpu.core_type = #tpu.core_type<tc>} {
    %c0 = arith.constant 0 : index
    %c0_0 = arith.constant 0 : index
    %0 = vector.load %arg0[%c0, %c0_0] : memref<8x128xbf16, #tpu.memory_space<vmem>>, vector<8x128xbf16>
    %c0_1 = arith.constant 0 : index
    %c0_2 = arith.constant 0 : index
    %1 = vector.load %arg1[%c0_1, %c0_2] : memref<128x384xbf16, #tpu.memory_space<vmem>>, vector<128x384xbf16>
    %cst = arith.constant dense<0.000000e+00> : vector<8x384xf32>
    %2 = tpu.matmul %0, %1, %cst {dimension_numbers = #tpu.dot_dimension_numbers<[1], [0], [0], [1], [0, 0, 1, 1], [], []>} : vector<8x128xbf16>, vector<128x384xbf16>, vector<8x384xf32> -> vector<8x384xf32>
    %c0_3 = arith.constant 0 : index
    %c0_4 = arith.constant 0 : index
    %3 = vector.load %arg3[%c0_3, %c0_4] : memref<1x384xf32, #tpu.memory_space<vmem>>, vector<1x384xf32>
    %4 = vector.broadcast %3 : vector<1x384xf32> to vector<8x384xf32>
    %5 = arith.addf %2, %4 : vector<8x384xf32>
    %c0_5 = arith.constant 0 : index
    %c0_6 = arith.constant 0 : index
    %6 = vector.load %arg2[%c0_5, %c0_6] : memref<128x384xbf16, #tpu.memory_space<vmem>>, vector<128x384xbf16>
    %c0_7 = arith.constant 0 : index
    %c0_8 = arith.constant 0 : index
    %7 = vector.load %arg4[%c0_7, %c0_8] : memref<1x128xf32, #tpu.memory_space<vmem>>, vector<1x128xf32>
    %c0_9 = arith.constant 0 : index
    %c0_10 = arith.constant 0 : index
    %8 = vector.load %arg5[%c0_9, %c0_10] : memref<1x128xf32, #tpu.memory_space<vmem>>, vector<1x128xf32>
    %9 = arith.truncf %8 : vector<1x128xf32> to vector<1x128xbf16>
    %cst_11 = arith.constant dense<0.000000e+00> : vector<1x384xf32>
    %10 = tpu.matmul %9, %6, %cst_11 {dimension_numbers = #tpu.dot_dimension_numbers<[1], [0], [0], [1], [0, 0, 1, 1], [], []>} : vector<1x128xbf16>, vector<128x384xbf16>, vector<1x384xf32> -> vector<1x384xf32>
    %11 = vector.extract_strided_slice %5 {offsets = [0, 0], sizes = [1, 384], strides = [1, 1]} : vector<8x384xf32> to vector<1x384xf32>
    %12 = vector.extract_strided_slice %11 {offsets = [0, 0], sizes = [1, 256], strides = [1, 1]} : vector<1x384xf32> to vector<1x256xf32>
    %13 = vector.extract_strided_slice %10 {offsets = [0, 0], sizes = [1, 256], strides = [1, 1]} : vector<1x384xf32> to vector<1x256xf32>
    %14 = arith.addf %12, %13 : vector<1x256xf32>
    %15 = arith.negf %14 : vector<1x256xf32>
    %16 = math.exp %15 : vector<1x256xf32>
    %cst_12 = arith.constant 1.000000e+00 : f32
    %17 = vector.broadcast %cst_12 : f32 to vector<1x256xf32>
    %18 = arith.addf %17, %16 : vector<1x256xf32>
    %19 = arith.divf %17, %18 : vector<1x256xf32>
    %20 = vector.extract_strided_slice %19 {offsets = [0, 0], sizes = [1, 128], strides = [1, 1]} : vector<1x256xf32> to vector<1x128xf32>
    %21 = vector.extract_strided_slice %19 {offsets = [0, 128], sizes = [1, 128], strides = [1, 1]} : vector<1x256xf32> to vector<1x128xf32>
    %22 = vector.extract_strided_slice %11 {offsets = [0, 256], sizes = [1, 128], strides = [1, 1]} : vector<1x384xf32> to vector<1x128xf32>
    %23 = vector.extract_strided_slice %10 {offsets = [0, 256], sizes = [1, 128], strides = [1, 1]} : vector<1x384xf32> to vector<1x128xf32>
    %24 = arith.addf %23, %7 : vector<1x128xf32>
    %25 = arith.mulf %20, %24 : vector<1x128xf32>
    %26 = arith.addf %22, %25 : vector<1x128xf32>
    %27 = math.tanh %26 : vector<1x128xf32>
    %cst_13 = arith.constant 1.000000e+00 : f32
    %28 = vector.broadcast %cst_13 : f32 to vector<1x128xf32>
    %29 = arith.subf %28, %21 : vector<1x128xf32>
    %30 = arith.mulf %29, %27 : vector<1x128xf32>
    %31 = arith.mulf %21, %8 : vector<1x128xf32>
    %32 = arith.addf %30, %31 : vector<1x128xf32>
    %33 = arith.truncf %32 : vector<1x128xf32> to vector<1x128xbf16>
    %cst_14 = arith.constant dense<0.000000e+00> : vector<1x384xf32>
    %34 = tpu.matmul %33, %6, %cst_14 {dimension_numbers = #tpu.dot_dimension_numbers<[1], [0], [0], [1], [0, 0, 1, 1], [], []>} : vector<1x128xbf16>, vector<128x384xbf16>, vector<1x384xf32> -> vector<1x384xf32>
    %35 = vector.extract_strided_slice %5 {offsets = [1, 0], sizes = [1, 384], strides = [1, 1]} : vector<8x384xf32> to vector<1x384xf32>
    %36 = vector.extract_strided_slice %35 {offsets = [0, 0], sizes = [1, 256], strides = [1, 1]} : vector<1x384xf32> to vector<1x256xf32>
    %37 = vector.extract_strided_slice %34 {offsets = [0, 0], sizes = [1, 256], strides = [1, 1]} : vector<1x384xf32> to vector<1x256xf32>
    %38 = arith.addf %36, %37 : vector<1x256xf32>
    %39 = arith.negf %38 : vector<1x256xf32>
    %40 = math.exp %39 : vector<1x256xf32>
    %cst_15 = arith.constant 1.000000e+00 : f32
    %41 = vector.broadcast %cst_15 : f32 to vector<1x256xf32>
    %42 = arith.addf %41, %40 : vector<1x256xf32>
    %43 = arith.divf %41, %42 : vector<1x256xf32>
    %44 = vector.extract_strided_slice %43 {offsets = [0, 0], sizes = [1, 128], strides = [1, 1]} : vector<1x256xf32> to vector<1x128xf32>
    %45 = vector.extract_strided_slice %43 {offsets = [0, 128], sizes = [1, 128], strides = [1, 1]} : vector<1x256xf32> to vector<1x128xf32>
    %46 = vector.extract_strided_slice %35 {offsets = [0, 256], sizes = [1, 128], strides = [1, 1]} : vector<1x384xf32> to vector<1x128xf32>
    %47 = vector.extract_strided_slice %34 {offsets = [0, 256], sizes = [1, 128], strides = [1, 1]} : vector<1x384xf32> to vector<1x128xf32>
    %48 = arith.addf %47, %7 : vector<1x128xf32>
    %49 = arith.mulf %44, %48 : vector<1x128xf32>
    %50 = arith.addf %46, %49 : vector<1x128xf32>
    %51 = math.tanh %50 : vector<1x128xf32>
    %cst_16 = arith.constant 1.000000e+00 : f32
    %52 = vector.broadcast %cst_16 : f32 to vector<1x128xf32>
    %53 = arith.subf %52, %45 : vector<1x128xf32>
    %54 = arith.mulf %53, %51 : vector<1x128xf32>
    %55 = arith.mulf %45, %32 : vector<1x128xf32>
    %56 = arith.addf %54, %55 : vector<1x128xf32>
    %57 = arith.truncf %56 : vector<1x128xf32> to vector<1x128xbf16>
    %cst_17 = arith.constant dense<0.000000e+00> : vector<1x384xf32>
    %58 = tpu.matmul %57, %6, %cst_17 {dimension_numbers = #tpu.dot_dimension_numbers<[1], [0], [0], [1], [0, 0, 1, 1], [], []>} : vector<1x128xbf16>, vector<128x384xbf16>, vector<1x384xf32> -> vector<1x384xf32>
    %59 = vector.extract_strided_slice %5 {offsets = [2, 0], sizes = [1, 384], strides = [1, 1]} : vector<8x384xf32> to vector<1x384xf32>
    %60 = vector.extract_strided_slice %59 {offsets = [0, 0], sizes = [1, 256], strides = [1, 1]} : vector<1x384xf32> to vector<1x256xf32>
    %61 = vector.extract_strided_slice %58 {offsets = [0, 0], sizes = [1, 256], strides = [1, 1]} : vector<1x384xf32> to vector<1x256xf32>
    %62 = arith.addf %60, %61 : vector<1x256xf32>
    %63 = arith.negf %62 : vector<1x256xf32>
    %64 = math.exp %63 : vector<1x256xf32>
    %cst_18 = arith.constant 1.000000e+00 : f32
    %65 = vector.broadcast %cst_18 : f32 to vector<1x256xf32>
    %66 = arith.addf %65, %64 : vector<1x256xf32>
    %67 = arith.divf %65, %66 : vector<1x256xf32>
    %68 = vector.extract_strided_slice %67 {offsets = [0, 0], sizes = [1, 128], strides = [1, 1]} : vector<1x256xf32> to vector<1x128xf32>
    %69 = vector.extract_strided_slice %67 {offsets = [0, 128], sizes = [1, 128], strides = [1, 1]} : vector<1x256xf32> to vector<1x128xf32>
    %70 = vector.extract_strided_slice %59 {offsets = [0, 256], sizes = [1, 128], strides = [1, 1]} : vector<1x384xf32> to vector<1x128xf32>
    %71 = vector.extract_strided_slice %58 {offsets = [0, 256], sizes = [1, 128], strides = [1, 1]} : vector<1x384xf32> to vector<1x128xf32>
    %72 = arith.addf %71, %7 : vector<1x128xf32>
    %73 = arith.mulf %68, %72 : vector<1x128xf32>
    %74 = arith.addf %70, %73 : vector<1x128xf32>
    %75 = math.tanh %74 : vector<1x128xf32>
    %cst_19 = arith.constant 1.000000e+00 : f32
    %76 = vector.broadcast %cst_19 : f32 to vector<1x128xf32>
    %77 = arith.subf %76, %69 : vector<1x128xf32>
    %78 = arith.mulf %77, %75 : vector<1x128xf32>
    %79 = arith.mulf %69, %56 : vector<1x128xf32>
    %80 = arith.addf %78, %79 : vector<1x128xf32>
    %81 = arith.truncf %80 : vector<1x128xf32> to vector<1x128xbf16>
    %cst_20 = arith.constant dense<0.000000e+00> : vector<1x384xf32>
    %82 = tpu.matmul %81, %6, %cst_20 {dimension_numbers = #tpu.dot_dimension_numbers<[1], [0], [0], [1], [0, 0, 1, 1], [], []>} : vector<1x128xbf16>, vector<128x384xbf16>, vector<1x384xf32> -> vector<1x384xf32>
    %83 = vector.extract_strided_slice %5 {offsets = [3, 0], sizes = [1, 384], strides = [1, 1]} : vector<8x384xf32> to vector<1x384xf32>
    %84 = vector.extract_strided_slice %83 {offsets = [0, 0], sizes = [1, 256], strides = [1, 1]} : vector<1x384xf32> to vector<1x256xf32>
    %85 = vector.extract_strided_slice %82 {offsets = [0, 0], sizes = [1, 256], strides = [1, 1]} : vector<1x384xf32> to vector<1x256xf32>
    %86 = arith.addf %84, %85 : vector<1x256xf32>
    %87 = arith.negf %86 : vector<1x256xf32>
    %88 = math.exp %87 : vector<1x256xf32>
    %cst_21 = arith.constant 1.000000e+00 : f32
    %89 = vector.broadcast %cst_21 : f32 to vector<1x256xf32>
    %90 = arith.addf %89, %88 : vector<1x256xf32>
    %91 = arith.divf %89, %90 : vector<1x256xf32>
    %92 = vector.extract_strided_slice %91 {offsets = [0, 0], sizes = [1, 128], strides = [1, 1]} : vector<1x256xf32> to vector<1x128xf32>
    %93 = vector.extract_strided_slice %91 {offsets = [0, 128], sizes = [1, 128], strides = [1, 1]} : vector<1x256xf32> to vector<1x128xf32>
    %94 = vector.extract_strided_slice %83 {offsets = [0, 256], sizes = [1, 128], strides = [1, 1]} : vector<1x384xf32> to vector<1x128xf32>
    %95 = vector.extract_strided_slice %82 {offsets = [0, 256], sizes = [1, 128], strides = [1, 1]} : vector<1x384xf32> to vector<1x128xf32>
    %96 = arith.addf %95, %7 : vector<1x128xf32>
    %97 = arith.mulf %92, %96 : vector<1x128xf32>
    %98 = arith.addf %94, %97 : vector<1x128xf32>
    %99 = math.tanh %98 : vector<1x128xf32>
    %cst_22 = arith.constant 1.000000e+00 : f32
    %100 = vector.broadcast %cst_22 : f32 to vector<1x128xf32>
    %101 = arith.subf %100, %93 : vector<1x128xf32>
    %102 = arith.mulf %101, %99 : vector<1x128xf32>
    %103 = arith.mulf %93, %80 : vector<1x128xf32>
    %104 = arith.addf %102, %103 : vector<1x128xf32>
    %105 = arith.truncf %104 : vector<1x128xf32> to vector<1x128xbf16>
    %cst_23 = arith.constant dense<0.000000e+00> : vector<1x384xf32>
    %106 = tpu.matmul %105, %6, %cst_23 {dimension_numbers = #tpu.dot_dimension_numbers<[1], [0], [0], [1], [0, 0, 1, 1], [], []>} : vector<1x128xbf16>, vector<128x384xbf16>, vector<1x384xf32> -> vector<1x384xf32>
    %107 = vector.extract_strided_slice %5 {offsets = [4, 0], sizes = [1, 384], strides = [1, 1]} : vector<8x384xf32> to vector<1x384xf32>
    %108 = vector.extract_strided_slice %107 {offsets = [0, 0], sizes = [1, 256], strides = [1, 1]} : vector<1x384xf32> to vector<1x256xf32>
    %109 = vector.extract_strided_slice %106 {offsets = [0, 0], sizes = [1, 256], strides = [1, 1]} : vector<1x384xf32> to vector<1x256xf32>
    %110 = arith.addf %108, %109 : vector<1x256xf32>
    %111 = arith.negf %110 : vector<1x256xf32>
    %112 = math.exp %111 : vector<1x256xf32>
    %cst_24 = arith.constant 1.000000e+00 : f32
    %113 = vector.broadcast %cst_24 : f32 to vector<1x256xf32>
    %114 = arith.addf %113, %112 : vector<1x256xf32>
    %115 = arith.divf %113, %114 : vector<1x256xf32>
    %116 = vector.extract_strided_slice %115 {offsets = [0, 0], sizes = [1, 128], strides = [1, 1]} : vector<1x256xf32> to vector<1x128xf32>
    %117 = vector.extract_strided_slice %115 {offsets = [0, 128], sizes = [1, 128], strides = [1, 1]} : vector<1x256xf32> to vector<1x128xf32>
    %118 = vector.extract_strided_slice %107 {offsets = [0, 256], sizes = [1, 128], strides = [1, 1]} : vector<1x384xf32> to vector<1x128xf32>
    %119 = vector.extract_strided_slice %106 {offsets = [0, 256], sizes = [1, 128], strides = [1, 1]} : vector<1x384xf32> to vector<1x128xf32>
    %120 = arith.addf %119, %7 : vector<1x128xf32>
    %121 = arith.mulf %116, %120 : vector<1x128xf32>
    %122 = arith.addf %118, %121 : vector<1x128xf32>
    %123 = math.tanh %122 : vector<1x128xf32>
    %cst_25 = arith.constant 1.000000e+00 : f32
    %124 = vector.broadcast %cst_25 : f32 to vector<1x128xf32>
    %125 = arith.subf %124, %117 : vector<1x128xf32>
    %126 = arith.mulf %125, %123 : vector<1x128xf32>
    %127 = arith.mulf %117, %104 : vector<1x128xf32>
    %128 = arith.addf %126, %127 : vector<1x128xf32>
    %129 = arith.truncf %128 : vector<1x128xf32> to vector<1x128xbf16>
    %cst_26 = arith.constant dense<0.000000e+00> : vector<1x384xf32>
    %130 = tpu.matmul %129, %6, %cst_26 {dimension_numbers = #tpu.dot_dimension_numbers<[1], [0], [0], [1], [0, 0, 1, 1], [], []>} : vector<1x128xbf16>, vector<128x384xbf16>, vector<1x384xf32> -> vector<1x384xf32>
    %131 = vector.extract_strided_slice %5 {offsets = [5, 0], sizes = [1, 384], strides = [1, 1]} : vector<8x384xf32> to vector<1x384xf32>
    %132 = vector.extract_strided_slice %131 {offsets = [0, 0], sizes = [1, 256], strides = [1, 1]} : vector<1x384xf32> to vector<1x256xf32>
    %133 = vector.extract_strided_slice %130 {offsets = [0, 0], sizes = [1, 256], strides = [1, 1]} : vector<1x384xf32> to vector<1x256xf32>
    %134 = arith.addf %132, %133 : vector<1x256xf32>
    %135 = arith.negf %134 : vector<1x256xf32>
    %136 = math.exp %135 : vector<1x256xf32>
    %cst_27 = arith.constant 1.000000e+00 : f32
    %137 = vector.broadcast %cst_27 : f32 to vector<1x256xf32>
    %138 = arith.addf %137, %136 : vector<1x256xf32>
    %139 = arith.divf %137, %138 : vector<1x256xf32>
    %140 = vector.extract_strided_slice %139 {offsets = [0, 0], sizes = [1, 128], strides = [1, 1]} : vector<1x256xf32> to vector<1x128xf32>
    %141 = vector.extract_strided_slice %139 {offsets = [0, 128], sizes = [1, 128], strides = [1, 1]} : vector<1x256xf32> to vector<1x128xf32>
    %142 = vector.extract_strided_slice %131 {offsets = [0, 256], sizes = [1, 128], strides = [1, 1]} : vector<1x384xf32> to vector<1x128xf32>
    %143 = vector.extract_strided_slice %130 {offsets = [0, 256], sizes = [1, 128], strides = [1, 1]} : vector<1x384xf32> to vector<1x128xf32>
    %144 = arith.addf %143, %7 : vector<1x128xf32>
    %145 = arith.mulf %140, %144 : vector<1x128xf32>
    %146 = arith.addf %142, %145 : vector<1x128xf32>
    %147 = math.tanh %146 : vector<1x128xf32>
    %cst_28 = arith.constant 1.000000e+00 : f32
    %148 = vector.broadcast %cst_28 : f32 to vector<1x128xf32>
    %149 = arith.subf %148, %141 : vector<1x128xf32>
    %150 = arith.mulf %149, %147 : vector<1x128xf32>
    %151 = arith.mulf %141, %128 : vector<1x128xf32>
    %152 = arith.addf %150, %151 : vector<1x128xf32>
    %153 = arith.truncf %152 : vector<1x128xf32> to vector<1x128xbf16>
    %cst_29 = arith.constant dense<0.000000e+00> : vector<1x384xf32>
    %154 = tpu.matmul %153, %6, %cst_29 {dimension_numbers = #tpu.dot_dimension_numbers<[1], [0], [0], [1], [0, 0, 1, 1], [], []>} : vector<1x128xbf16>, vector<128x384xbf16>, vector<1x384xf32> -> vector<1x384xf32>
    %155 = vector.extract_strided_slice %5 {offsets = [6, 0], sizes = [1, 384], strides = [1, 1]} : vector<8x384xf32> to vector<1x384xf32>
    %156 = vector.extract_strided_slice %155 {offsets = [0, 0], sizes = [1, 256], strides = [1, 1]} : vector<1x384xf32> to vector<1x256xf32>
    %157 = vector.extract_strided_slice %154 {offsets = [0, 0], sizes = [1, 256], strides = [1, 1]} : vector<1x384xf32> to vector<1x256xf32>
    %158 = arith.addf %156, %157 : vector<1x256xf32>
    %159 = arith.negf %158 : vector<1x256xf32>
    %160 = math.exp %159 : vector<1x256xf32>
    %cst_30 = arith.constant 1.000000e+00 : f32
    %161 = vector.broadcast %cst_30 : f32 to vector<1x256xf32>
    %162 = arith.addf %161, %160 : vector<1x256xf32>
    %163 = arith.divf %161, %162 : vector<1x256xf32>
    %164 = vector.extract_strided_slice %163 {offsets = [0, 0], sizes = [1, 128], strides = [1, 1]} : vector<1x256xf32> to vector<1x128xf32>
    %165 = vector.extract_strided_slice %163 {offsets = [0, 128], sizes = [1, 128], strides = [1, 1]} : vector<1x256xf32> to vector<1x128xf32>
    %166 = vector.extract_strided_slice %155 {offsets = [0, 256], sizes = [1, 128], strides = [1, 1]} : vector<1x384xf32> to vector<1x128xf32>
    %167 = vector.extract_strided_slice %154 {offsets = [0, 256], sizes = [1, 128], strides = [1, 1]} : vector<1x384xf32> to vector<1x128xf32>
    %168 = arith.addf %167, %7 : vector<1x128xf32>
    %169 = arith.mulf %164, %168 : vector<1x128xf32>
    %170 = arith.addf %166, %169 : vector<1x128xf32>
    %171 = math.tanh %170 : vector<1x128xf32>
    %cst_31 = arith.constant 1.000000e+00 : f32
    %172 = vector.broadcast %cst_31 : f32 to vector<1x128xf32>
    %173 = arith.subf %172, %165 : vector<1x128xf32>
    %174 = arith.mulf %173, %171 : vector<1x128xf32>
    %175 = arith.mulf %165, %152 : vector<1x128xf32>
    %176 = arith.addf %174, %175 : vector<1x128xf32>
    %177 = arith.truncf %176 : vector<1x128xf32> to vector<1x128xbf16>
    %cst_32 = arith.constant dense<0.000000e+00> : vector<1x384xf32>
    %178 = tpu.matmul %177, %6, %cst_32 {dimension_numbers = #tpu.dot_dimension_numbers<[1], [0], [0], [1], [0, 0, 1, 1], [], []>} : vector<1x128xbf16>, vector<128x384xbf16>, vector<1x384xf32> -> vector<1x384xf32>
    %179 = vector.extract_strided_slice %5 {offsets = [7, 0], sizes = [1, 384], strides = [1, 1]} : vector<8x384xf32> to vector<1x384xf32>
    %180 = vector.extract_strided_slice %179 {offsets = [0, 0], sizes = [1, 256], strides = [1, 1]} : vector<1x384xf32> to vector<1x256xf32>
    %181 = vector.extract_strided_slice %178 {offsets = [0, 0], sizes = [1, 256], strides = [1, 1]} : vector<1x384xf32> to vector<1x256xf32>
    %182 = arith.addf %180, %181 : vector<1x256xf32>
    %183 = arith.negf %182 : vector<1x256xf32>
    %184 = math.exp %183 : vector<1x256xf32>
    %cst_33 = arith.constant 1.000000e+00 : f32
    %185 = vector.broadcast %cst_33 : f32 to vector<1x256xf32>
    %186 = arith.addf %185, %184 : vector<1x256xf32>
    %187 = arith.divf %185, %186 : vector<1x256xf32>
    %188 = vector.extract_strided_slice %187 {offsets = [0, 0], sizes = [1, 128], strides = [1, 1]} : vector<1x256xf32> to vector<1x128xf32>
    %189 = vector.extract_strided_slice %187 {offsets = [0, 128], sizes = [1, 128], strides = [1, 1]} : vector<1x256xf32> to vector<1x128xf32>
    %190 = vector.extract_strided_slice %179 {offsets = [0, 256], sizes = [1, 128], strides = [1, 1]} : vector<1x384xf32> to vector<1x128xf32>
    %191 = vector.extract_strided_slice %178 {offsets = [0, 256], sizes = [1, 128], strides = [1, 1]} : vector<1x384xf32> to vector<1x128xf32>
    %192 = arith.addf %191, %7 : vector<1x128xf32>
    %193 = arith.mulf %188, %192 : vector<1x128xf32>
    %194 = arith.addf %190, %193 : vector<1x128xf32>
    %195 = math.tanh %194 : vector<1x128xf32>
    %cst_34 = arith.constant 1.000000e+00 : f32
    %196 = vector.broadcast %cst_34 : f32 to vector<1x128xf32>
    %197 = arith.subf %196, %189 : vector<1x128xf32>
    %198 = arith.mulf %197, %195 : vector<1x128xf32>
    %199 = arith.mulf %189, %176 : vector<1x128xf32>
    %200 = arith.addf %198, %199 : vector<1x128xf32>
    %201 = tpu.concatenate %32, %56, %80, %104, %128, %152, %176, %200 in 0 : vector<1x128xf32>, vector<1x128xf32>, vector<1x128xf32>, vector<1x128xf32>, vector<1x128xf32>, vector<1x128xf32>, vector<1x128xf32>, vector<1x128xf32> -> vector<8x128xf32>
    %c0_35 = arith.constant 0 : index
    %c0_36 = arith.constant 0 : index
    %202 = vector.load %arg6[%c0_35, %c0_36] : memref<8x128xf32, #tpu.memory_space<vmem>>, vector<8x128xf32>
    tpu.vector_store %arg6[%c0_35, %c0_36], %201 {strides = array<i32>} : memref<8x128xf32, #tpu.memory_space<vmem>>, vector<8x128xf32>,
    return
  }
}

</mosaic_0001>

<bundles_post_ra>
// kernel: encoder_gru_sequence.1
= control target key start
LH: loop header
LB: loop body
LE: loop exit
PB: predicated region body
PF: predicated region fallthrough
CT: control target
= control target key end

     0   :  { %11 = vsyncpa [#allocation3], 0  ;;  %s2470_s0 = inlined_call_operand.vmem [shape: bf16[8,128], index: 0, kind: input, shape index: {}]   ;;  %s2471_s1 = inlined_call_operand.hbm [shape: bf16[128,384], index: 1, kind: input, shape index: {}]   ;;  %s2472_s2 = inlined_call_operand.hbm [shape: bf16[128,384], index: 2, kind: input, shape index: {}]   ;;  %s2473_s3 = inlined_call_operand.vmem [shape: f32[1,384], index: 3, kind: input, shape index: {}]   ;;  %s2474_s4 = inlined_call_operand.vmem [shape: f32[1,128], index: 4, kind: input, shape index: {}]   ;;  %s2475_s5 = inlined_call_operand.vmem [shape: f32[1,128], index: 5, kind: input, shape index: {}]   ;;  %s2476_s6 = inlined_call_operand.vmem [shape: f32[8,128], index: 6, kind: output, shape index: {}]  }
   0x1   :  { %12 = vsyncpa [#allocation5], 0  ;;  %s1977_s21 = smov [#allocation2]   ;;  %s1929_s25 = scalar_lea.hbm %s2471_s1, 3072 }
   0x2   :  { %s20_s22 = sshll.u32 %s1977_s21, 4  ;;  %p1930_p0 = scmp.ne.s32.totalorder %s2471_s1, %s1929_s25  ;;  %s21_s22 = int_to_ptr.vmem [resolvable:$true] %s20_s22 }
   0x3   :  { %p1933_p1 = scmp.lt.u32.totalorder %s1929_s25, %s2471_s1 }
   0x5   :  { %p1935_p2 = pnand %p1933_p1, %p1930_p0 }
   0x7   :  { %1938 = shalt.err (!%p1935_p2)
}
   0x8   :  { %s1939_s30 = scalar_lea.vmem %s21_s22, 3072  ;;  %p1944_p4 = scmp.lt.s32.totalorder %s21_s22, %s21_s22 }
   0x9   :  { %p1940_p3 = scmp.ne.s32.totalorder %s21_s22, %s1939_s30  ;;  %p1945_p5 = scmp.lt.s32.totalorder %s1939_s30, %s1939_s30 }
   0xb   :  { %p1946_p6 = por %p1945_p5, %p1944_p4 }
   0xd   :  { %p1947_p7 = pnand %p1946_p6, %p1940_p3 }
   0xf   :  { %1950 = shalt.err (!%p1947_p7)
}
  0x10   :  { %s1978_s7 = smov 192   ;;  %s1979_s8 = smov 12  }
  0x11   :  { %26 = dma.hbm_to_vmem [thread:$0]  %s2471_s1, 3072, %s21_s22, [#allocation3], %s1978_s7, %s1978_s7, %s1979_s8  }
  0x12   :  { %s1980_s11 = smov [#allocation4]   ;;  %s1951_s15 = scalar_lea.hbm %s2472_s2, 3072 }
  0x13   :  { %s32_s12 = sshll.u32 %s1980_s11, 4  ;;  %p1952_p8 = scmp.ne.s32.totalorder %s2472_s2, %s1951_s15  ;;  %s33_s12 = int_to_ptr.vmem [resolvable:$true] %s32_s12 }
  0x14   :  { %p1955_p9 = scmp.lt.u32.totalorder %s1951_s15, %s2472_s2 }
  0x16   :  { %p1957_p10 = pnand %p1955_p9, %p1952_p8 }
  0x18   :  { %1960 = shalt.err (!%p1957_p10)
}
  0x19   :  { %s1961_s20 = scalar_lea.vmem %s33_s12, 3072  ;;  %p1966_p12 = scmp.lt.s32.totalorder %s33_s12, %s33_s12 }
  0x1a   :  { %p1962_p11 = scmp.ne.s32.totalorder %s33_s12, %s1961_s20  ;;  %p1967_p13 = scmp.lt.s32.totalorder %s1961_s20, %s1961_s20 }
  0x1c   :  { %p1968_p0 = por %p1967_p13, %p1966_p12 }
  0x1e   :  { %p1969_p1 = pnand %p1968_p0, %p1962_p11 }
  0x20   :  { %1972 = shalt.err (!%p1969_p1)
}
  0x21   :  { %38 = dma.hbm_to_vmem [thread:$0]  %s2472_s2, 3072, %s33_s12, [#allocation5], %s1978_s7, %s1978_s7, %s1979_s8  }
  0x22   :  { %1973 = dma.done.wait [#allocation3], 3072  }
  0x23   :  { %1974 = vsyncadd [#allocation3], 4294964224 }
  0x24   :  { %1975 = dma.done.wait [#allocation5], 3072  }
  0x25   :  { %1976 = vsyncadd [#allocation5], 4294964224  ;;  %v1981_v0 = vmov 0.0   ;;  %v1982_v1 = vmov 0   ;;  %vm1983_vm0 = vmmov 0   ;;  %v87_v61 = vlaneseq }
  0x26   :  { %1578 = vmatprep.subr.bf16.mxu1 %v1981_v0  ;;  %262 = vmatprep.mubr.bf16.mxu0 %v1982_v1  ;;  %v1765_v2 = vld [vmem:[#allocation2 + $0x4] ss:$12 sps:$4 sm:$0xff]   ;;  %v1767_v3 = vld [vmem:[#allocation2] ss:$12 sps:$4 sm:$0xff]   ;;  %v1768_v4 = vld [vmem:[#allocation2 + $0x1c] ss:$12 sps:$4 sm:$0xff]  }
  0x27   :  { %1594 = vmatprep.mubr.msk.bf16.mxu1 %vm1983_vm0, %v1981_v0  ;;  %230 = vmatprep.subr.bf16.mxu0 %v1765_v2  ;;  %v1770_v5 = vld [vmem:[#allocation2 + $0x18] ss:$12 sps:$4 sm:$0xff]   ;;  %v1771_v6 = vld [vmem:[#allocation2 + $0x34] ss:$12 sps:$4 sm:$0xff]   ;;  %v1773_v7 = vld [vmem:[#allocation2 + $0x30] ss:$12 sps:$4 sm:$0xff]  }
  0x28   :  { %231 = vmatpush1.bf16.msra.mxu0 %v1767_v3  ;;  %v1774_v8 = vld [vmem:[#allocation2 + $0x4c] ss:$12 sps:$4 sm:$0xff]   ;;  %v1785_v9 = vld [vmem:[#allocation2 + $0x8] ss:$12 sps:$4 sm:$0xff]   ;;  %v1777_v11 = vld [vmem:[#allocation2 + $0x64] ss:$12 sps:$4 sm:$0xff]  }
  0x29   :  { %232 = vmatprep.subr.bf16.mxu0 %v1768_v4  ;;  %v1776_v10 = vld [vmem:[#allocation2 + $0x48] ss:$12 sps:$4 sm:$0xff]   ;;  %1579 = vmatpush3.bf16.msra.mxu1 %v1785_v9  ;;  %v1789_v12 = vld [vmem:[#allocation2 + $0x20] ss:$12 sps:$4 sm:$0xff]   ;;  %v1791_v14 = vld [vmem:[#allocation2 + $0x38] ss:$12 sps:$4 sm:$0xff]  }
  0x2a   :  { %1580 = vmatprep.subr.bf16.mxu1 %v1981_v0  ;;  %v1779_v13 = vld [vmem:[#allocation2 + $0x60] ss:$12 sps:$4 sm:$0xff]   ;;  %v1780_v15 = vld [vmem:[#allocation2 + $0x7c] ss:$12 sps:$4 sm:$0xff]   ;;  %v1782_v16 = vld [vmem:[#allocation2 + $0x78] ss:$12 sps:$4 sm:$0xff]  }
  0x2b   :  { %v1795_v17 = vld [vmem:[#allocation2 + $0x50] ss:$12 sps:$4 sm:$0xff]   ;;  %v1783_v18 = vld [vmem:[#allocation2 + $0x94] ss:$12 sps:$4 sm:$0xff]   ;;  %v1787_v21 = vld [vmem:[#allocation2 + $0xac] ss:$12 sps:$4 sm:$0xff]  }
  0x2c   :  { %233 = vmatpush1.bf16.msra.mxu0 %v1770_v5  ;;  %v1786_v19 = vld [vmem:[#allocation2 + $0x90] ss:$12 sps:$4 sm:$0xff]   ;;  %v1799_v20 = vld [vmem:[#allocation2 + $0x68] ss:$12 sps:$4 sm:$0xff]   ;;  %v1803_v23 = vld [vmem:[#allocation2 + $0x80] ss:$12 sps:$4 sm:$0xff]  }
  0x2d   :  { %234 = vmatprep.subr.bf16.mxu0 %v1771_v6  ;;  %1581 = vmatpush3.bf16.msra.mxu1 %v1789_v12  ;;  %v1790_v22 = vld [vmem:[#allocation2 + $0xa8] ss:$12 sps:$4 sm:$0xff]   ;;  %v2051_v24 = vld [vmem:[#allocation4 + $0x4] ss:$12 sps:$4 sm:$0xff]   ;;  %v52_v25 = vld [vmem:[%s2470_s0] sm:$0xf] }
  0x2e   :  { %1582 = vmatprep.subr.bf16.mxu1 %v1981_v0  ;;  %v2057_v26 = vld [vmem:[#allocation4] ss:$12 sps:$4 sm:$0xff]   ;;  %v1807_v27 = vld [vmem:[#allocation2 + $0x98] ss:$12 sps:$4 sm:$0xff]   ;;  %v2060_v28 = vld [vmem:[#allocation4 + $0x1c] ss:$12 sps:$4 sm:$0xff]  }
  0x2f   :  { %v2063_v29 = vld [vmem:[#allocation4 + $0x18] ss:$12 sps:$4 sm:$0xff]   ;;  %v1811_v30 = vld [vmem:[#allocation2 + $0xb0] ss:$12 sps:$4 sm:$0xff]   ;;  %v2067_v31 = vld [vmem:[#allocation4 + $0x34] ss:$12 sps:$4 sm:$0xff]  }
  0x30   :  { %235 = vmatpush1.bf16.msra.mxu0 %v1773_v7  ;;  %v2072_v32 = vld [vmem:[#allocation4 + $0x30] ss:$12 sps:$4 sm:$0xff]   ;;  %v2074_v33 = vld [vmem:[#allocation4 + $0x8] ss:$12 sps:$4 sm:$0xff]   ;;  %v2077_v34 = vld [vmem:[#allocation4 + $0x4c] ss:$12 sps:$4 sm:$0xff]  }
  0x31   :  { %236 = vmatprep.subr.bf16.mxu0 %v1774_v8  ;;  %1583 = vmatpush3.bf16.msra.mxu1 %v1791_v14  ;;  %v2081_v35 = vld [vmem:[#allocation4 + $0x48] ss:$12 sps:$4 sm:$0xff]   ;;  %v2084_v36 = vld [vmem:[#allocation4 + $0x20] ss:$12 sps:$4 sm:$0xff]   ;;  %v2087_v37 = vld [vmem:[#allocation4 + $0x64] ss:$12 sps:$4 sm:$0xff]  }
  0x32   :  { %1584 = vmatprep.subr.bf16.mxu1 %v1981_v0  ;;  %v2093_v38 = vld [vmem:[#allocation4 + $0x60] ss:$12 sps:$4 sm:$0xff]   ;;  %v2096_v39 = vld [vmem:[#allocation4 + $0x38] ss:$12 sps:$4 sm:$0xff]   ;;  %v2099_v40 = vld [vmem:[#allocation4 + $0x7c] ss:$12 sps:$4 sm:$0xff]  }
  0x33   :  { %v2103_v41 = vld [vmem:[#allocation4 + $0x78] ss:$12 sps:$4 sm:$0xff]   ;;  %v2106_v42 = vld [vmem:[#allocation4 + $0x50] ss:$12 sps:$4 sm:$0xff]   ;;  %v2109_v43 = vld [vmem:[#allocation4 + $0x94] ss:$12 sps:$4 sm:$0xff]  }
  0x34   :  { %237 = vmatpush1.bf16.msra.mxu0 %v1776_v10  ;;  %v2113_v44 = vld [vmem:[#allocation4 + $0x90] ss:$12 sps:$4 sm:$0xff]   ;;  %v2116_v45 = vld [vmem:[#allocation4 + $0x68] ss:$12 sps:$4 sm:$0xff]   ;;  %v2119_v46 = vld [vmem:[#allocation4 + $0xac] ss:$12 sps:$4 sm:$0xff]  }
  0x35   :  { %238 = vmatprep.subr.bf16.mxu0 %v1777_v11  ;;  %1585 = vmatpush3.bf16.msra.mxu1 %v1795_v17  ;;  %v2123_v47 = vld [vmem:[#allocation4 + $0xa8] ss:$12 sps:$4 sm:$0xff]   ;;  %v2128_v48 = vld [vmem:[%s2475_s5] sm:$0x1]  ;;  %v2139_v51 = vld [vmem:[#allocation4 + $0x98] ss:$12 sps:$4 sm:$0xff]  }
  0x36   :  { %1586 = vmatprep.subr.bf16.mxu1 %v1981_v0  ;;  %v2131_v49 = vld [vmem:[#allocation4 + $0x80] ss:$12 sps:$4 sm:$0xff]   ;;  %v345_v50 = vpack.c.bf16 %v2128_v48, %v2128_v48  ;;  %v2144_v52 = vld [vmem:[#allocation4 + $0xb0] ss:$12 sps:$4 sm:$0xff]   ;;  %v88_v62 = vshrl.u32 %v87_v61, 7  ;;  %vm1412_vm1 = vcmask 1040384  }
  0x37   :  { %v85_v2 = vld [vmem:[%s2473_s3] sm:$0x7]  ;;  %vm1414_vm2 = vcmask 1041408   ;;  %vm1416_vm3 = vcmask 1042432   ;;  %vm1418_vm4 = vcmask 1043456   ;;  %vm1420_vm5 = vcmask 1044480  }
  0x38   :  { %239 = vmatpush1.bf16.msra.mxu0 %v1779_v13  ;;  %v89_v63 = vsub.s32 0, %v88_v62  ;;  %v93_v3 = vsub.s32 1, %v88_v62  ;;  %vm1422_vm6 = vcmask 1045504   ;;  %vm1424_vm7 = vcmask 1046528  }
  0x39   :  { %240 = vmatprep.subr.bf16.mxu0 %v1780_v15  ;;  %1587 = vmatpush3.bf16.msra.mxu1 %v1799_v20 }
  0x3a   :  { %1588 = vmatprep.subr.bf16.mxu1 %v1981_v0  ;;  %v90_v4 = vrot.slane %v85_v2, %v89_v63  ;;  %v94_v5 = vrot.slane %v85_v2, %v93_v3 }
  0x3c   :  { %241 = vmatpush1.bf16.msra.mxu0 %v1782_v16 }
  0x3d   :  { %242 = vmatprep.subr.bf16.mxu0 %v1783_v18  ;;  %1589 = vmatpush3.bf16.msra.mxu1 %v1803_v23 }
  0x3e   :  { %1590 = vmatprep.subr.bf16.mxu1 %v1981_v0 }
  0x40   :  { %243 = vmatpush1.bf16.msra.mxu0 %v1786_v19 }
  0x41   :  { %244 = vmatprep.subr.bf16.mxu0 %v1787_v21  ;;  %1591 = vmatpush3.bf16.msra.mxu1 %v1807_v27 }
  0x42   :  { %1592 = vmatprep.subr.bf16.mxu1 %v1981_v0 }
  0x44   :  { %245 = vmatpush1.bf16.msra.mxu0 %v1790_v22  ;;  %v97_v22 = vsub.s32 2, %v88_v62 }
  0x45   :  { %474 = vmatprep.subr.bf16.mxu0 %v2051_v24  ;;  %1593 = vmatpush3.bf16.msra.mxu1 %v1811_v30 }
  0x46   :  { %1598 = vmatprep.subr.bf16.mxu1 %v1981_v0  ;;  %v98_v27 = vrot.slane %v85_v2, %v97_v22 }
  0x47   :  { %263 = vmatmul.mubr.bf16.vlgmr.msra.gmra.mrb[0].mxu0 %v52_v25 }
  0x48   :  { %475 = vmatpush1.bf16.msra.mxu0 %v2057_v26  ;;  %506 = vmatprep.mubr.bf16.mxu0 %v1982_v1 }
  0x49   :  { %476 = vmatprep.subr.bf16.mxu0 %v2060_v28  ;;  %1595 = vmatmul.mubr.bf16.vlgmr.msra.gmra.mrb[0].mxu1 %v52_v25  ;;  %v2196_v25 = vld [vmem:[%s2474_s4] sm:$0x1] }
  0x4a   :  { %1599 = vmatpush3.bf16.msra.mxu1 %v2074_v33  ;;  %1614 = vmatprep.mubr.msk.bf16.mxu1 %vm1983_vm0, %v1981_v0 }
  0x4b   :  { %1600 = vmatprep.subr.bf16.mxu1 %v1981_v0 }
  0x4c   :  { %477 = vmatpush1.bf16.msra.mxu0 %v2063_v29 }
  0x4d   :  { %478 = vmatprep.subr.bf16.mxu0 %v2067_v31 }
  0x4e   :  { %1601 = vmatpush3.bf16.msra.mxu1 %v2084_v36 }
  0x4f   :  { %1602 = vmatprep.subr.bf16.mxu1 %v1981_v0 }
  0x50   :  { %479 = vmatpush1.bf16.msra.mxu0 %v2072_v32 }
  0x51   :  { %480 = vmatprep.subr.bf16.mxu0 %v2077_v34 }
  0x52   :  { %1603 = vmatpush3.bf16.msra.mxu1 %v2096_v39 }
  0x53   :  { %1604 = vmatprep.subr.bf16.mxu1 %v1981_v0 }
  0x54   :  { %481 = vmatpush1.bf16.msra.mxu0 %v2081_v35 }
  0x55   :  { %482 = vmatprep.subr.bf16.mxu0 %v2087_v37 }
  0x56   :  { %1605 = vmatpush3.bf16.msra.mxu1 %v2106_v42 }
  0x57   :  { %1606 = vmatprep.subr.bf16.mxu1 %v1981_v0 }
  0x58   :  { %483 = vmatpush1.bf16.msra.mxu0 %v2093_v38 }
  0x59   :  { %484 = vmatprep.subr.bf16.mxu0 %v2099_v40 }
  0x5a   :  { %1607 = vmatpush3.bf16.msra.mxu1 %v2116_v45 }
  0x5b   :  { %1608 = vmatprep.subr.bf16.mxu1 %v1981_v0 }
  0x5c   :  { %485 = vmatpush1.bf16.msra.mxu0 %v2103_v41 }
  0x5d   :  { %486 = vmatprep.subr.bf16.mxu0 %v2109_v43 }
  0x5e   :  { %1609 = vmatpush3.bf16.msra.mxu1 %v2131_v49 }
  0x5f   :  { %1610 = vmatprep.subr.bf16.mxu1 %v1981_v0 }
  0x60   :  { %487 = vmatpush1.bf16.msra.mxu0 %v2113_v44 }
  0x61   :  { %488 = vmatprep.subr.bf16.mxu0 %v2119_v46 }
  0x62   :  { %1611 = vmatpush3.bf16.msra.mxu1 %v2139_v51 }
  0x63   :  { %1612 = vmatprep.subr.bf16.mxu1 %v1981_v0 }
  0x64   :  { %489 = vmatpush1.bf16.msra.mxu0 %v2123_v47 }
  0x65   :  { %578 = vmatprep.subr.bf16.mxu0 %v2051_v24 }
  0x66   :  { %1613 = vmatpush3.bf16.msra.mxu1 %v2144_v52 }
  0x67   :  { %507 = vmatmul.mubr.bf16.vlgmr.msra.gmra.mrb[4].mxu0 %v345_v50  ;;  %1618 = vmatprep.subr.bf16.mxu1 %v1981_v0 }
  0x68   :  { %579 = vmatpush1.bf16.msra.mxu0 %v2057_v26  ;;  %610 = vmatprep.mubr.bf16.mxu0 %v1982_v1 }
  0x69   :  { %580 = vmatprep.subr.bf16.mxu0 %v2060_v28  ;;  %1615 = vmatmul.mubr.bf16.vlgmr.msra.gmra.mrb[4].mxu1 %v345_v50 }
  0x6a   :  { %1619 = vmatpush3.bf16.msra.mxu1 %v2074_v33  ;;  %1634 = vmatprep.mubr.msk.bf16.mxu1 %vm1983_vm0, %v1981_v0 }
  0x6b   :  { %1620 = vmatprep.subr.bf16.mxu1 %v1981_v0 }
  0x6c   :  { %581 = vmatpush1.bf16.msra.mxu0 %v2063_v29 }
  0x6d   :  { %582 = vmatprep.subr.bf16.mxu0 %v2067_v31 }
  0x6e   :  { %1621 = vmatpush3.bf16.msra.mxu1 %v2084_v36 }
  0x6f   :  { %1622 = vmatprep.subr.bf16.mxu1 %v1981_v0 }
  0x70   :  { %583 = vmatpush1.bf16.msra.mxu0 %v2072_v32 }
  0x71   :  { %584 = vmatprep.subr.bf16.mxu0 %v2077_v34 }
  0x72   :  { %1623 = vmatpush3.bf16.msra.mxu1 %v2096_v39 }
  0x73   :  { %1624 = vmatprep.subr.bf16.mxu1 %v1981_v0 }
  0x74   :  { %585 = vmatpush1.bf16.msra.mxu0 %v2081_v35 }
  0x75   :  { %586 = vmatprep.subr.bf16.mxu0 %v2087_v37 }
  0x76   :  { %1625 = vmatpush3.bf16.msra.mxu1 %v2106_v42 }
  0x77   :  { %1626 = vmatprep.subr.bf16.mxu1 %v1981_v0 }
  0x78   :  { %587 = vmatpush1.bf16.msra.mxu0 %v2093_v38 }
  0x79   :  { %588 = vmatprep.subr.bf16.mxu0 %v2099_v40 }
  0x7a   :  { %1627 = vmatpush3.bf16.msra.mxu1 %v2116_v45 }
  0x7b   :  { %1628 = vmatprep.subr.bf16.mxu1 %v1981_v0 }
  0x7c   :  { %589 = vmatpush1.bf16.msra.mxu0 %v2103_v41 }
  0x7d   :  { %590 = vmatprep.subr.bf16.mxu0 %v2109_v43 }
  0x7e   :  { %1629 = vmatpush3.bf16.msra.mxu1 %v2131_v49 }
  0x7f   :  { %1630 = vmatprep.subr.bf16.mxu1 %v1981_v0 }
  0x80   :  { %591 = vmatpush1.bf16.msra.mxu0 %v2113_v44 }
  0x81   :  { %592 = vmatprep.subr.bf16.mxu0 %v2119_v46 }
  0x82   :  { %1631 = vmatpush3.bf16.msra.mxu1 %v2139_v51 }
  0x83   :  { %1632 = vmatprep.subr.bf16.mxu1 %v1981_v0 }
  0x84   :  { %593 = vmatpush1.bf16.msra.mxu0 %v2123_v47 }
  0x85   :  { %698 = vmatprep.subr.bf16.mxu0 %v2051_v24 }
  0x86   :  { %1633 = vmatpush3.bf16.msra.mxu1 %v2144_v52 }
  0x87   :  { %1638 = vmatprep.subr.bf16.mxu1 %v1981_v0 }
 0x11a   :  { %v264_v53 = vpop.f32.mrb[0].mxu0 }
 0x11b   :  { %v266_v54 = vpop.f32.mrb[1].mxu0  ;;  %v2187_v6 = vadd.f32 %v264_v53, %v90_v4 }
 0x11c   :  { %v268_v55 = vpop.f32.mrb[2].mxu0  ;;  %v305_v57 = vpop.f32.mrb[0].mxu1  ;;  %v2190_v10 = vadd.f32 %v266_v54, %v94_v5 }
 0x11d   :  { %v269_v56 = vpop.f32.mrb[3].mxu0  ;;  %v1596_v58 = vpop.f32.mrb[1].mxu1  ;;  %v2199_v54 = vadd.f32 %v305_v57, %v98_v27 }
 0x11e   :  { %v308_v59 = vpop.f32.mrb[2].mxu1 }
 0x11f   :  { %v1597_v60 = vpop.f32.mrb[3].mxu1 }
 0x13a   :  { %v508_v7 = vpop.f32.mrb[4].mxu0 }
 0x13b   :  { %v555_v8 = vadd.f32 %v508_v7, %v2187_v6  ;;  %v510_v9 = vpop.f32.mrb[5].mxu0 }
 0x13c   :  { %v512_v11 = vpop.f32.mrb[6].mxu0  ;;  %v556_v14 = vadd.f32 %v510_v9, %v2190_v10  ;;  %v549_v16 = vpop.f32.mrb[4].mxu1 }
 0x13d   :  { %v1481_v12 = vmul.f32 -1.442695, %v555_v8  ;;  %v513_v13 = vpop.f32.mrb[7].mxu0  ;;  %v1616_v17 = vpop.f32.mrb[5].mxu1  ;;  %v569_v50 = vadd.f32 %v549_v16, %v2196_v25 }
 0x13e   :  { %v1482_v15 = vmul.f32 -1.442695, %v556_v14  ;;  %v552_v18 = vpop.f32.mrb[6].mxu1 }
 0x13f   :  { %1829 = vpow2.f32 %v1481_v12  ;;  %v1617_v19 = vpop.f32.mrb[7].mxu1 }
 0x140   :  { %1831 = vpow2.f32 %v1482_v15 }
 0x149   :  { %v1830_v20 = vpop.eup %1829 }
 0x14a   :  { %v563_v21 = vadd.f32 1.0, %v1830_v20  ;;  %v1832_v23 = vpop.eup %1831 }
 0x14b   :  { %v564_v30 = vadd.f32 1.0, %v1832_v23 }
 0x14c   :  { %1833 = vrcp.f32 %v563_v21 }
 0x14d   :  { %1835 = vrcp.f32 %v564_v30 }
 0x156   :  { %v1834_v53 = vpop.eup %1833 }
 0x157   :  { %v570_v55 = vmul.f32 %v1834_v53, %v569_v50  ;;  %v1836_v58 = vpop.eup %1835 }
 0x158   :  { %v573_v59 = vsub.f32 1.0, %v1836_v58  ;;  %v575_v62 = vmul.f32 %v1836_v58, %v2128_v48 }
 0x159   :  { %v571_v56 = vadd.f32 %v570_v55, %v2199_v54 }
 0x15b   :  { %1837 = vtanh.f32 %v571_v56 }
 0x165   :  { %v1838_v60 = vpop.eup %1837 }
 0x166   :  { %v574_v61 = vmul.f32 %v1838_v60, %v573_v59 }
 0x168   :  { %v2203_v63 = vadd.f32 %v575_v62, %v574_v61 }
 0x16a   :  { %v577_v2 = vpack.c.bf16 %v2203_v63, %v2203_v63  ;;  %v689_v55 = vrot.slane %v2203_v63, 7 }
 0x16c   :  { %611 = vmatmul.mubr.bf16.vlgmr.msra.gmra.mrb[8].mxu0 %v577_v2  ;;  %1635 = vmatmul.mubr.bf16.vlgmr.msra.gmra.mrb[8].mxu1 %v577_v2 }
 0x16d   :  { %699 = vmatpush1.bf16.msra.mxu0 %v2057_v26  ;;  %1639 = vmatpush3.bf16.msra.mxu1 %v2074_v33 }
 0x16e   :  { %700 = vmatprep.subr.bf16.mxu0 %v2060_v28  ;;  %1640 = vmatprep.subr.bf16.mxu1 %v1981_v0 }
 0x16f   :  { %730 = vmatprep.mubr.bf16.mxu0 %v1982_v1  ;;  %1654 = vmatprep.mubr.msk.bf16.mxu1 %vm1983_vm0, %v1981_v0 }
 0x171   :  { %701 = vmatpush1.bf16.msra.mxu0 %v2063_v29  ;;  %1641 = vmatpush3.bf16.msra.mxu1 %v2084_v36 }
 0x172   :  { %702 = vmatprep.subr.bf16.mxu0 %v2067_v31  ;;  %1642 = vmatprep.subr.bf16.mxu1 %v1981_v0 }
 0x175   :  { %703 = vmatpush1.bf16.msra.mxu0 %v2072_v32  ;;  %1643 = vmatpush3.bf16.msra.mxu1 %v2096_v39 }
 0x176   :  { %704 = vmatprep.subr.bf16.mxu0 %v2077_v34  ;;  %1644 = vmatprep.subr.bf16.mxu1 %v1981_v0 }
 0x179   :  { %705 = vmatpush1.bf16.msra.mxu0 %v2081_v35  ;;  %1645 = vmatpush3.bf16.msra.mxu1 %v2106_v42 }
 0x17a   :  { %706 = vmatprep.subr.bf16.mxu0 %v2087_v37  ;;  %1646 = vmatprep.subr.bf16.mxu1 %v1981_v0 }
 0x17d   :  { %707 = vmatpush1.bf16.msra.mxu0 %v2093_v38  ;;  %1647 = vmatpush3.bf16.msra.mxu1 %v2116_v45 }
 0x17e   :  { %708 = vmatprep.subr.bf16.mxu0 %v2099_v40  ;;  %1648 = vmatprep.subr.bf16.mxu1 %v1981_v0 }
 0x181   :  { %709 = vmatpush1.bf16.msra.mxu0 %v2103_v41  ;;  %1649 = vmatpush3.bf16.msra.mxu1 %v2131_v49 }
 0x182   :  { %710 = vmatprep.subr.bf16.mxu0 %v2109_v43  ;;  %1650 = vmatprep.subr.bf16.mxu1 %v1981_v0 }
 0x185   :  { %711 = vmatpush1.bf16.msra.mxu0 %v2113_v44  ;;  %1651 = vmatpush3.bf16.msra.mxu1 %v2139_v51 }
 0x186   :  { %712 = vmatprep.subr.bf16.mxu0 %v2119_v46  ;;  %1652 = vmatprep.subr.bf16.mxu1 %v1981_v0 }
 0x189   :  { %713 = vmatpush1.bf16.msra.mxu0 %v2123_v47  ;;  %1653 = vmatpush3.bf16.msra.mxu1 %v2144_v52 }
 0x18a   :  { %817 = vmatprep.subr.bf16.mxu0 %v2051_v24  ;;  %1658 = vmatprep.subr.bf16.mxu1 %v1981_v0 }
 0x23f   :  { %v612_v48 = vpop.f32.mrb[8].mxu0  ;;  %v653_v57 = vpop.f32.mrb[8].mxu1 }
 0x240   :  { %v661_v3 = vrot.slane %v612_v48, 7  ;;  %v614_v4 = vpop.f32.mrb[9].mxu0  ;;  %v1636_v5 = vpop.f32.mrb[9].mxu1  ;;  %v679_v20 = vadd.f32 %v653_v57, %v2196_v25 }
 0x241   :  { %v662_v7 = vrot.slane %v614_v4, 7  ;;  %v616_v8 = vpop.f32.mrb[10].mxu0  ;;  %v656_v9 = vpop.f32.mrb[10].mxu1 }
 0x242   :  { %v665_v11 = vadd.f32 %v661_v3, %v2187_v6  ;;  %v617_v12 = vpop.f32.mrb[11].mxu0  ;;  %v1637_v13 = vpop.f32.mrb[11].mxu1  ;;  %v681_v22 = vrot.slane %v679_v20, 7 }
 0x243   :  { %v666_v15 = vadd.f32 %v662_v7, %v2190_v10 }
 0x244   :  { %v1483_v14 = vmul.f32 -1.442695, %v665_v11 }
 0x245   :  { %v1484_v16 = vmul.f32 -1.442695, %v666_v15 }
 0x246   :  { %1839 = vpow2.f32 %v1483_v14 }
 0x247   :  { %1841 = vpow2.f32 %v1484_v16 }
 0x250   :  { %v1840_v17 = vpop.eup %1839 }
 0x251   :  { %v673_v18 = vadd.f32 1.0, %v1840_v17  ;;  %v1842_v19 = vpop.eup %1841 }
 0x252   :  { %v674_v21 = vadd.f32 1.0, %v1842_v19 }
 0x253   :  { %1843 = vrcp.f32 %v673_v18 }
 0x254   :  { %1845 = vrcp.f32 %v674_v21 }
 0x25d   :  { %v1844_v23 = vpop.eup %1843 }
 0x25e   :  { %v683_v27 = vmul.f32 %v1844_v23, %v681_v22  ;;  %v1846_v50 = vpop.eup %1845 }
 0x25f   :  { %v686_v53 = vsub.f32 1.0, %v1846_v50  ;;  %v691_v59 = vmul.f32 %v1846_v50, %v689_v55 }
 0x260   :  { %v684_v30 = vadd.f32 %v683_v27, %v2199_v54 }
 0x262   :  { %1847 = vtanh.f32 %v684_v30 }
 0x26c   :  { %v1848_v56 = vpop.eup %1847 }
 0x26d   :  { %v687_v58 = vmul.f32 %v1848_v56, %v686_v53 }
 0x26f   :  { %v2247_v60 = vadd.f32 %v691_v59, %v687_v58 }
 0x271   :  { %v693_v61 = vpack.c.bf16 %v2247_v60, %v2247_v60  ;;  %v809_v23 = vrot.slane %v2247_v60, 7 }
 0x273   :  { %v695_v62 = vshrl.u32 %v693_v61, 16  ;;  %v1413_v61 = vsel %vm1412_vm1, %v2203_v63, %v2247_v60 }
 0x275   :  { %731 = vmatmul.mubr.bf16.vlgmr.msra.gmra.mrb[12].mxu0 %v695_v62  ;;  %1655 = vmatmul.mubr.bf16.vlgmr.msra.gmra.mrb[12].mxu1 %v695_v62 }
 0x276   :  { %818 = vmatpush1.bf16.msra.mxu0 %v2057_v26  ;;  %1659 = vmatpush3.bf16.msra.mxu1 %v2074_v33 }
 0x277   :  { %819 = vmatprep.subr.bf16.mxu0 %v2060_v28  ;;  %1660 = vmatprep.subr.bf16.mxu1 %v1981_v0 }
 0x278   :  { %849 = vmatprep.mubr.bf16.mxu0 %v1982_v1  ;;  %1674 = vmatprep.mubr.msk.bf16.mxu1 %vm1983_vm0, %v1981_v0 }
 0x27a   :  { %820 = vmatpush1.bf16.msra.mxu0 %v2063_v29  ;;  %1661 = vmatpush3.bf16.msra.mxu1 %v2084_v36 }
 0x27b   :  { %821 = vmatprep.subr.bf16.mxu0 %v2067_v31  ;;  %1662 = vmatprep.subr.bf16.mxu1 %v1981_v0 }
 0x27e   :  { %822 = vmatpush1.bf16.msra.mxu0 %v2072_v32  ;;  %1663 = vmatpush3.bf16.msra.mxu1 %v2096_v39 }
 0x27f   :  { %823 = vmatprep.subr.bf16.mxu0 %v2077_v34  ;;  %1664 = vmatprep.subr.bf16.mxu1 %v1981_v0 }
 0x282   :  { %824 = vmatpush1.bf16.msra.mxu0 %v2081_v35  ;;  %1665 = vmatpush3.bf16.msra.mxu1 %v2106_v42 }
 0x283   :  { %825 = vmatprep.subr.bf16.mxu0 %v2087_v37  ;;  %1666 = vmatprep.subr.bf16.mxu1 %v1981_v0 }
 0x286   :  { %826 = vmatpush1.bf16.msra.mxu0 %v2093_v38  ;;  %1667 = vmatpush3.bf16.msra.mxu1 %v2116_v45 }
 0x287   :  { %827 = vmatprep.subr.bf16.mxu0 %v2099_v40  ;;  %1668 = vmatprep.subr.bf16.mxu1 %v1981_v0 }
 0x28a   :  { %828 = vmatpush1.bf16.msra.mxu0 %v2103_v41  ;;  %1669 = vmatpush3.bf16.msra.mxu1 %v2131_v49 }
 0x28b   :  { %829 = vmatprep.subr.bf16.mxu0 %v2109_v43  ;;  %1670 = vmatprep.subr.bf16.mxu1 %v1981_v0 }
 0x28e   :  { %830 = vmatpush1.bf16.msra.mxu0 %v2113_v44  ;;  %1671 = vmatpush3.bf16.msra.mxu1 %v2139_v51 }
 0x28f   :  { %831 = vmatprep.subr.bf16.mxu0 %v2119_v46  ;;  %1672 = vmatprep.subr.bf16.mxu1 %v1981_v0 }
 0x292   :  { %832 = vmatpush1.bf16.msra.mxu0 %v2123_v47  ;;  %1673 = vmatpush3.bf16.msra.mxu1 %v2144_v52 }
 0x293   :  { %938 = vmatprep.subr.bf16.mxu0 %v2051_v24  ;;  %1678 = vmatprep.subr.bf16.mxu1 %v1981_v0 }
 0x348   :  { %v732_v2 = vpop.f32.mrb[12].mxu0  ;;  %v773_v48 = vpop.f32.mrb[12].mxu1 }
 0x349   :  { %v781_v57 = vrot.slane %v732_v2, 6  ;;  %v734_v3 = vpop.f32.mrb[13].mxu0  ;;  %v1656_v4 = vpop.f32.mrb[13].mxu1  ;;  %v799_v20 = vadd.f32 %v773_v48, %v2196_v25 }
 0x34a   :  { %v782_v5 = vrot.slane %v734_v3, 6  ;;  %v736_v7 = vpop.f32.mrb[14].mxu0  ;;  %v776_v8 = vpop.f32.mrb[14].mxu1 }
 0x34b   :  { %v785_v9 = vadd.f32 %v781_v57, %v2187_v6  ;;  %v737_v11 = vpop.f32.mrb[15].mxu0  ;;  %v1657_v12 = vpop.f32.mrb[15].mxu1  ;;  %v801_v21 = vrot.slane %v799_v20, 6 }
 0x34c   :  { %v786_v13 = vadd.f32 %v782_v5, %v2190_v10 }
 0x34d   :  { %v1485_v14 = vmul.f32 -1.442695, %v785_v9 }
 0x34e   :  { %v1486_v15 = vmul.f32 -1.442695, %v786_v13 }
 0x34f   :  { %1849 = vpow2.f32 %v1485_v14 }
 0x350   :  { %1851 = vpow2.f32 %v1486_v15 }
 0x359   :  { %v1850_v16 = vpop.eup %1849 }
 0x35a   :  { %v1852_v17 = vpop.eup %1851  ;;  %v793_v18 = vadd.f32 1.0, %v1850_v16 }
 0x35b   :  { %v794_v19 = vadd.f32 1.0, %v1852_v17 }
 0x35c   :  { %1853 = vrcp.f32 %v793_v18 }
 0x35d   :  { %1855 = vrcp.f32 %v794_v19 }
 0x366   :  { %v1854_v22 = vpop.eup %1853 }
 0x367   :  { %v1856_v27 = vpop.eup %1855  ;;  %v803_v30 = vmul.f32 %v1854_v22, %v801_v21 }
 0x368   :  { %v811_v50 = vmul.f32 %v1856_v27, %v809_v23  ;;  %v806_v55 = vsub.f32 1.0, %v1856_v27 }
 0x369   :  { %v804_v53 = vadd.f32 %v803_v30, %v2199_v54 }
 0x36b   :  { %1857 = vtanh.f32 %v804_v53 }
 0x375   :  { %v1858_v56 = vpop.eup %1857 }
 0x376   :  { %v807_v58 = vmul.f32 %v1858_v56, %v806_v55 }
 0x378   :  { %v2291_v59 = vadd.f32 %v811_v50, %v807_v58 }
 0x37a   :  { %v813_v62 = vpack.c.bf16 %v2291_v59, %v2291_v59  ;;  %v2298_v2 = vsel %vm1414_vm2, %v1413_v61, %v2291_v59  ;;  %v928_v23 = vrot.slane %v2291_v59, 7 }
 0x37c   :  { %v815_v48 = vrot.slane %v813_v62, 1 }
 0x37e   :  { %850 = vmatmul.mubr.bf16.vlgmr.msra.gmra.mrb[16].mxu0 %v815_v48  ;;  %1675 = vmatmul.mubr.bf16.vlgmr.msra.gmra.mrb[16].mxu1 %v815_v48 }
 0x37f   :  { %939 = vmatpush1.bf16.msra.mxu0 %v2057_v26  ;;  %1679 = vmatpush3.bf16.msra.mxu1 %v2074_v33 }
 0x380   :  { %940 = vmatprep.subr.bf16.mxu0 %v2060_v28  ;;  %1680 = vmatprep.subr.bf16.mxu1 %v1981_v0 }
 0x381   :  { %970 = vmatprep.mubr.bf16.mxu0 %v1982_v1  ;;  %1694 = vmatprep.mubr.msk.bf16.mxu1 %vm1983_vm0, %v1981_v0 }
 0x383   :  { %941 = vmatpush1.bf16.msra.mxu0 %v2063_v29  ;;  %1681 = vmatpush3.bf16.msra.mxu1 %v2084_v36 }
 0x384   :  { %942 = vmatprep.subr.bf16.mxu0 %v2067_v31  ;;  %1682 = vmatprep.subr.bf16.mxu1 %v1981_v0 }
 0x387   :  { %943 = vmatpush1.bf16.msra.mxu0 %v2072_v32  ;;  %1683 = vmatpush3.bf16.msra.mxu1 %v2096_v39 }
 0x388   :  { %944 = vmatprep.subr.bf16.mxu0 %v2077_v34  ;;  %1684 = vmatprep.subr.bf16.mxu1 %v1981_v0 }
 0x38b   :  { %945 = vmatpush1.bf16.msra.mxu0 %v2081_v35  ;;  %1685 = vmatpush3.bf16.msra.mxu1 %v2106_v42 }
 0x38c   :  { %946 = vmatprep.subr.bf16.mxu0 %v2087_v37  ;;  %1686 = vmatprep.subr.bf16.mxu1 %v1981_v0 }
 0x38f   :  { %947 = vmatpush1.bf16.msra.mxu0 %v2093_v38  ;;  %1687 = vmatpush3.bf16.msra.mxu1 %v2116_v45 }
 0x390   :  { %948 = vmatprep.subr.bf16.mxu0 %v2099_v40  ;;  %1688 = vmatprep.subr.bf16.mxu1 %v1981_v0 }
 0x393   :  { %949 = vmatpush1.bf16.msra.mxu0 %v2103_v41  ;;  %1689 = vmatpush3.bf16.msra.mxu1 %v2131_v49 }
 0x394   :  { %950 = vmatprep.subr.bf16.mxu0 %v2109_v43  ;;  %1690 = vmatprep.subr.bf16.mxu1 %v1981_v0 }
 0x397   :  { %951 = vmatpush1.bf16.msra.mxu0 %v2113_v44  ;;  %1691 = vmatpush3.bf16.msra.mxu1 %v2139_v51 }
 0x398   :  { %952 = vmatprep.subr.bf16.mxu0 %v2119_v46  ;;  %1692 = vmatprep.subr.bf16.mxu1 %v1981_v0 }
 0x39b   :  { %953 = vmatpush1.bf16.msra.mxu0 %v2123_v47  ;;  %1693 = vmatpush3.bf16.msra.mxu1 %v2144_v52 }
 0x39c   :  { %1057 = vmatprep.subr.bf16.mxu0 %v2051_v24  ;;  %1698 = vmatprep.subr.bf16.mxu1 %v1981_v0 }
 0x451   :  { %v851_v63 = vpop.f32.mrb[16].mxu0  ;;  %v892_v60 = vpop.f32.mrb[16].mxu1 }
 0x452   :  { %v900_v57 = vrot.slane %v851_v63, 5  ;;  %v853_v3 = vpop.f32.mrb[17].mxu0  ;;  %v1676_v4 = vpop.f32.mrb[17].mxu1  ;;  %v918_v20 = vadd.f32 %v892_v60, %v2196_v25 }
 0x453   :  { %v901_v5 = vrot.slane %v853_v3, 5  ;;  %v855_v7 = vpop.f32.mrb[18].mxu0  ;;  %v895_v8 = vpop.f32.mrb[18].mxu1 }
 0x454   :  { %v904_v9 = vadd.f32 %v900_v57, %v2187_v6  ;;  %v856_v11 = vpop.f32.mrb[19].mxu0  ;;  %v1677_v12 = vpop.f32.mrb[19].mxu1  ;;  %v920_v21 = vrot.slane %v918_v20, 5 }
 0x455   :  { %v905_v13 = vadd.f32 %v901_v5, %v2190_v10 }
 0x456   :  { %v1487_v14 = vmul.f32 -1.442695, %v904_v9 }
 0x457   :  { %v1488_v15 = vmul.f32 -1.442695, %v905_v13 }
 0x458   :  { %1859 = vpow2.f32 %v1487_v14 }
 0x459   :  { %1861 = vpow2.f32 %v1488_v15 }
 0x462   :  { %v1860_v16 = vpop.eup %1859 }
 0x463   :  { %v1862_v17 = vpop.eup %1861  ;;  %v912_v18 = vadd.f32 1.0, %v1860_v16 }
 0x464   :  { %v913_v19 = vadd.f32 1.0, %v1862_v17 }
 0x465   :  { %1863 = vrcp.f32 %v912_v18 }
 0x466   :  { %1865 = vrcp.f32 %v913_v19 }
 0x46f   :  { %v1864_v22 = vpop.eup %1863 }
 0x470   :  { %v1866_v27 = vpop.eup %1865  ;;  %v922_v30 = vmul.f32 %v1864_v22, %v920_v21 }
 0x471   :  { %v930_v50 = vmul.f32 %v1866_v27, %v928_v23  ;;  %v925_v55 = vsub.f32 1.0, %v1866_v27 }
 0x472   :  { %v923_v53 = vadd.f32 %v922_v30, %v2199_v54 }
 0x474   :  { %1867 = vtanh.f32 %v923_v53 }
 0x47e   :  { %v1868_v56 = vpop.eup %1867 }
 0x47f   :  { %v926_v58 = vmul.f32 %v1868_v56, %v925_v55 }
 0x481   :  { %v2340_v61 = vadd.f32 %v930_v50, %v926_v58 }
 0x483   :  { %v932_v62 = vpack.c.bf16 %v2340_v61, %v2340_v61  ;;  %v2346_v48 = vsel %vm1416_vm3, %v2298_v2, %v2340_v61  ;;  %v1049_v22 = vrot.slane %v2340_v61, 7 }
 0x485   :  { %v934_v59 = vshrl.u32 %v932_v62, 16 }
 0x487   :  { %v936_v63 = vrot.slane %v934_v59, 1 }
 0x489   :  { %971 = vmatmul.mubr.bf16.vlgmr.msra.gmra.mrb[20].mxu0 %v936_v63  ;;  %1695 = vmatmul.mubr.bf16.vlgmr.msra.gmra.mrb[20].mxu1 %v936_v63 }
 0x48a   :  { %1058 = vmatpush1.bf16.msra.mxu0 %v2057_v26  ;;  %1699 = vmatpush3.bf16.msra.mxu1 %v2074_v33 }
 0x48b   :  { %1059 = vmatprep.subr.bf16.mxu0 %v2060_v28  ;;  %1700 = vmatprep.subr.bf16.mxu1 %v1981_v0 }
 0x48c   :  { %1089 = vmatprep.mubr.bf16.mxu0 %v1982_v1  ;;  %1714 = vmatprep.mubr.msk.bf16.mxu1 %vm1983_vm0, %v1981_v0 }
 0x48e   :  { %1060 = vmatpush1.bf16.msra.mxu0 %v2063_v29  ;;  %1701 = vmatpush3.bf16.msra.mxu1 %v2084_v36 }
 0x48f   :  { %1061 = vmatprep.subr.bf16.mxu0 %v2067_v31  ;;  %1702 = vmatprep.subr.bf16.mxu1 %v1981_v0 }
 0x492   :  { %1062 = vmatpush1.bf16.msra.mxu0 %v2072_v32  ;;  %1703 = vmatpush3.bf16.msra.mxu1 %v2096_v39 }
 0x493   :  { %1063 = vmatprep.subr.bf16.mxu0 %v2077_v34  ;;  %1704 = vmatprep.subr.bf16.mxu1 %v1981_v0 }
 0x496   :  { %1064 = vmatpush1.bf16.msra.mxu0 %v2081_v35  ;;  %1705 = vmatpush3.bf16.msra.mxu1 %v2106_v42 }
 0x497   :  { %1065 = vmatprep.subr.bf16.mxu0 %v2087_v37  ;;  %1706 = vmatprep.subr.bf16.mxu1 %v1981_v0 }
 0x49a   :  { %1066 = vmatpush1.bf16.msra.mxu0 %v2093_v38  ;;  %1707 = vmatpush3.bf16.msra.mxu1 %v2116_v45 }
 0x49b   :  { %1067 = vmatprep.subr.bf16.mxu0 %v2099_v40  ;;  %1708 = vmatprep.subr.bf16.mxu1 %v1981_v0 }
 0x49e   :  { %1068 = vmatpush1.bf16.msra.mxu0 %v2103_v41  ;;  %1709 = vmatpush3.bf16.msra.mxu1 %v2131_v49 }
 0x49f   :  { %1069 = vmatprep.subr.bf16.mxu0 %v2109_v43  ;;  %1710 = vmatprep.subr.bf16.mxu1 %v1981_v0 }
 0x4a2   :  { %1070 = vmatpush1.bf16.msra.mxu0 %v2113_v44  ;;  %1711 = vmatpush3.bf16.msra.mxu1 %v2139_v51 }
 0x4a3   :  { %1071 = vmatprep.subr.bf16.mxu0 %v2119_v46  ;;  %1712 = vmatprep.subr.bf16.mxu1 %v1981_v0 }
 0x4a6   :  { %1072 = vmatpush1.bf16.msra.mxu0 %v2123_v47  ;;  %1713 = vmatpush3.bf16.msra.mxu1 %v2144_v52 }
 0x4a7   :  { %1178 = vmatprep.subr.bf16.mxu0 %v2051_v24  ;;  %1718 = vmatprep.subr.bf16.mxu1 %v1981_v0 }
 0x55c   :  { %v972_v2 = vpop.f32.mrb[20].mxu0  ;;  %v1013_v60 = vpop.f32.mrb[20].mxu1 }
 0x55d   :  { %v1021_v57 = vrot.slane %v972_v2, 4  ;;  %v974_v3 = vpop.f32.mrb[21].mxu0  ;;  %v1696_v4 = vpop.f32.mrb[21].mxu1  ;;  %v1039_v19 = vadd.f32 %v1013_v60, %v2196_v25 }
 0x55e   :  { %v1022_v5 = vrot.slane %v974_v3, 4  ;;  %v976_v7 = vpop.f32.mrb[22].mxu0  ;;  %v1016_v8 = vpop.f32.mrb[22].mxu1 }
 0x55f   :  { %v1025_v9 = vadd.f32 %v1021_v57, %v2187_v6  ;;  %v977_v11 = vpop.f32.mrb[23].mxu0  ;;  %v1697_v12 = vpop.f32.mrb[23].mxu1  ;;  %v1041_v20 = vrot.slane %v1039_v19, 4  ;;  %v1914_v19 = vld [vmem:[#allocation4 + $0x20] ss:$12 sps:$4 sm:$0xff]  }
 0x560   :  { %v1026_v13 = vadd.f32 %v1022_v5, %v2190_v10 }
 0x561   :  { %v1489_v14 = vmul.f32 -1.442695, %v1025_v9 }
 0x562   :  { %v1490_v15 = vmul.f32 -1.442695, %v1026_v13 }
 0x563   :  { %1869 = vpow2.f32 %v1489_v14 }
 0x564   :  { %1871 = vpow2.f32 %v1490_v15 }
 0x56d   :  { %v1870_v24 = vpop.eup %1869 }
 0x56e   :  { %v1872_v16 = vpop.eup %1871  ;;  %v1033_v17 = vadd.f32 1.0, %v1870_v24  ;;  %v1910_v24 = vld [vmem:[#allocation4] ss:$12 sps:$4 sm:$0xff]  }
 0x56f   :  { %v1034_v18 = vadd.f32 1.0, %v1872_v16  ;;  %v1911_v16 = vld [vmem:[#allocation4 + $0x8] ss:$12 sps:$4 sm:$0xff]  }
 0x570   :  { %1873 = vrcp.f32 %v1033_v17  ;;  %v1912_v17 = vld [vmem:[#allocation4 + $0x1c] ss:$12 sps:$4 sm:$0xff]  }
 0x571   :  { %1875 = vrcp.f32 %v1034_v18  ;;  %v1913_v18 = vld [vmem:[#allocation4 + $0x18] ss:$12 sps:$4 sm:$0xff]  }
 0x57a   :  { %v1874_v21 = vpop.eup %1873 }
 0x57b   :  { %v1876_v23 = vpop.eup %1875  ;;  %v1043_v27 = vmul.f32 %v1874_v21, %v1041_v20  ;;  %v1915_v20 = vld [vmem:[#allocation4 + $0x34] ss:$12 sps:$4 sm:$0xff]   ;;  %v1916_v21 = vld [vmem:[#allocation4 + $0x30] ss:$12 sps:$4 sm:$0xff]  }
 0x57c   :  { %v1051_v30 = vmul.f32 %v1876_v23, %v1049_v22  ;;  %v1046_v53 = vsub.f32 1.0, %v1876_v23  ;;  %v1917_v22 = vld [vmem:[#allocation4 + $0x38] ss:$12 sps:$4 sm:$0xff]  }
 0x57d   :  { %v1044_v50 = vadd.f32 %v1043_v27, %v2199_v54  ;;  %v1918_v23 = vld [vmem:[#allocation4 + $0x4c] ss:$12 sps:$4 sm:$0xff]   ;;  %v1920_v27 = vld [vmem:[#allocation4 + $0x50] ss:$12 sps:$4 sm:$0xff]  }
 0x57f   :  { %1877 = vtanh.f32 %v1044_v50  ;;  %v1922_v50 = vld [vmem:[#allocation4 + $0x60] ss:$12 sps:$4 sm:$0xff]  }
 0x589   :  { %v1878_v55 = vpop.eup %1877 }
 0x58a   :  { %v1047_v56 = vmul.f32 %v1878_v55, %v1046_v53  ;;  %v1923_v53 = vld [vmem:[#allocation4 + $0x7c] ss:$12 sps:$4 sm:$0xff]   ;;  %v1924_v55 = vld [vmem:[#allocation4 + $0x78] ss:$12 sps:$4 sm:$0xff]  }
 0x58c   :  { %v2388_v58 = vadd.f32 %v1051_v30, %v1047_v56  ;;  %v1921_v30 = vld [vmem:[#allocation4 + $0x64] ss:$12 sps:$4 sm:$0xff]   ;;  %v1925_v56 = vld [vmem:[#allocation4 + $0x94] ss:$12 sps:$4 sm:$0xff]  }
 0x58e   :  { %v1053_v62 = vpack.c.bf16 %v2388_v58, %v2388_v58  ;;  %v2394_v59 = vsel %vm1418_vm4, %v2346_v48, %v2388_v58  ;;  %v1168_v60 = vrot.slane %v2388_v58, 7  ;;  %v1926_v58 = vld [vmem:[#allocation4 + $0x90] ss:$12 sps:$4 sm:$0xff]  }
 0x590   :  { %v1055_v61 = vrot.slane %v1053_v62, 2  ;;  %v1927_v62 = vld [vmem:[#allocation4 + $0xac] ss:$12 sps:$4 sm:$0xff]  }
 0x592   :  { %1090 = vmatmul.mubr.bf16.vlgmr.msra.gmra.mrb[24].mxu0 %v1055_v61  ;;  %1715 = vmatmul.mubr.bf16.vlgmr.msra.gmra.mrb[24].mxu1 %v1055_v61 }
 0x593   :  { %1179 = vmatpush1.bf16.msra.mxu0 %v2057_v26  ;;  %1719 = vmatpush3.bf16.msra.mxu1 %v2074_v33  ;;  %v1909_v26 = vld [vmem:[#allocation4 + $0x4] ss:$12 sps:$4 sm:$0xff]  }
 0x594   :  { %1180 = vmatprep.subr.bf16.mxu0 %v2060_v28  ;;  %1720 = vmatprep.subr.bf16.mxu1 %v1981_v0 }
 0x595   :  { %1210 = vmatprep.mubr.bf16.mxu0 %v1982_v1  ;;  %1734 = vmatprep.mubr.msk.bf16.mxu1 %vm1983_vm0, %v1981_v0 }
 0x597   :  { %1181 = vmatpush1.bf16.msra.mxu0 %v2063_v29  ;;  %1721 = vmatpush3.bf16.msra.mxu1 %v2084_v36 }
 0x598   :  { %1182 = vmatprep.subr.bf16.mxu0 %v2067_v31  ;;  %1722 = vmatprep.subr.bf16.mxu1 %v1981_v0 }
 0x59b   :  { %1183 = vmatpush1.bf16.msra.mxu0 %v2072_v32  ;;  %1723 = vmatpush3.bf16.msra.mxu1 %v2096_v39 }
 0x59c   :  { %1184 = vmatprep.subr.bf16.mxu0 %v2077_v34  ;;  %1724 = vmatprep.subr.bf16.mxu1 %v1981_v0 }
 0x59f   :  { %1185 = vmatpush1.bf16.msra.mxu0 %v2081_v35  ;;  %1725 = vmatpush3.bf16.msra.mxu1 %v2106_v42 }
 0x5a0   :  { %1186 = vmatprep.subr.bf16.mxu0 %v2087_v37  ;;  %1726 = vmatprep.subr.bf16.mxu1 %v1981_v0 }
 0x5a3   :  { %1187 = vmatpush1.bf16.msra.mxu0 %v2093_v38  ;;  %1727 = vmatpush3.bf16.msra.mxu1 %v2116_v45 }
 0x5a4   :  { %1188 = vmatprep.subr.bf16.mxu0 %v2099_v40  ;;  %1728 = vmatprep.subr.bf16.mxu1 %v1981_v0 }
 0x5a7   :  { %1189 = vmatpush1.bf16.msra.mxu0 %v2103_v41  ;;  %1729 = vmatpush3.bf16.msra.mxu1 %v2131_v49 }
 0x5a8   :  { %1190 = vmatprep.subr.bf16.mxu0 %v2109_v43  ;;  %1730 = vmatprep.subr.bf16.mxu1 %v1981_v0 }
 0x5ab   :  { %1191 = vmatpush1.bf16.msra.mxu0 %v2113_v44  ;;  %1731 = vmatpush3.bf16.msra.mxu1 %v2139_v51 }
 0x5ac   :  { %1192 = vmatprep.subr.bf16.mxu0 %v2119_v46  ;;  %1732 = vmatprep.subr.bf16.mxu1 %v1981_v0 }
 0x5af   :  { %1193 = vmatpush1.bf16.msra.mxu0 %v2123_v47  ;;  %1733 = vmatpush3.bf16.msra.mxu1 %v2144_v52 }
 0x5b0   :  { %1297 = vmatprep.subr.bf16.mxu0 %v1909_v26  ;;  %1738 = vmatprep.subr.bf16.mxu1 %v1981_v0 }
 0x665   :  { %v1091_v28 = vpop.f32.mrb[24].mxu0  ;;  %v1132_v29 = vpop.f32.mrb[24].mxu1 }
 0x666   :  { %v1140_v31 = vrot.slane %v1091_v28, 3  ;;  %v1093_v32 = vpop.f32.mrb[25].mxu0  ;;  %v1716_v33 = vpop.f32.mrb[25].mxu1  ;;  %v1158_v48 = vadd.f32 %v1132_v29, %v2196_v25 }
 0x667   :  { %v1141_v34 = vrot.slane %v1093_v32, 3  ;;  %v1095_v35 = vpop.f32.mrb[26].mxu0  ;;  %v1135_v36 = vpop.f32.mrb[26].mxu1 }
 0x668   :  { %v1144_v37 = vadd.f32 %v1140_v31, %v2187_v6  ;;  %v1096_v38 = vpop.f32.mrb[27].mxu0  ;;  %v1717_v39 = vpop.f32.mrb[27].mxu1  ;;  %v1160_v63 = vrot.slane %v1158_v48, 3 }
 0x669   :  { %v1145_v40 = vadd.f32 %v1141_v34, %v2190_v10 }
 0x66a   :  { %v1491_v41 = vmul.f32 -1.442695, %v1144_v37 }
 0x66b   :  { %v1492_v42 = vmul.f32 -1.442695, %v1145_v40 }
 0x66c   :  { %1879 = vpow2.f32 %v1491_v41 }
 0x66d   :  { %1881 = vpow2.f32 %v1492_v42 }
 0x676   :  { %v1880_v43 = vpop.eup %1879 }
 0x677   :  { %v1882_v44 = vpop.eup %1881  ;;  %v1152_v46 = vadd.f32 1.0, %v1880_v43 }
 0x678   :  { %v1153_v47 = vadd.f32 1.0, %v1882_v44 }
 0x679   :  { %1883 = vrcp.f32 %v1152_v46 }
 0x67a   :  { %1885 = vrcp.f32 %v1153_v47 }
 0x683   :  { %v1884_v2 = vpop.eup %1883 }
 0x684   :  { %v1886_v57 = vpop.eup %1885  ;;  %v1162_v3 = vmul.f32 %v1884_v2, %v1160_v63 }
 0x685   :  { %v1170_v4 = vmul.f32 %v1886_v57, %v1168_v60  ;;  %v1165_v7 = vsub.f32 1.0, %v1886_v57 }
 0x686   :  { %v1163_v5 = vadd.f32 %v1162_v3, %v2199_v54 }
 0x688   :  { %1887 = vtanh.f32 %v1163_v5 }
 0x692   :  { %v1888_v8 = vpop.eup %1887 }
 0x693   :  { %v1166_v9 = vmul.f32 %v1888_v8, %v1165_v7 }
 0x695   :  { %v2435_v11 = vadd.f32 %v1170_v4, %v1166_v9 }
 0x697   :  { %v1172_v12 = vpack.c.bf16 %v2435_v11, %v2435_v11  ;;  %v2441_v13 = vsel %vm1420_vm5, %v2394_v59, %v2435_v11  ;;  %v1289_v43 = vrot.slane %v2435_v11, 7 }
 0x699   :  { %v1174_v14 = vshrl.u32 %v1172_v12, 16 }
 0x69b   :  { %v1176_v15 = vrot.slane %v1174_v14, 2 }
 0x69d   :  { %1211 = vmatmul.mubr.bf16.vlgmr.msra.gmra.mrb[28].mxu0 %v1176_v15  ;;  %1735 = vmatmul.mubr.bf16.vlgmr.msra.gmra.mrb[28].mxu1 %v1176_v15 }
 0x69e   :  { %1298 = vmatpush1.bf16.msra.mxu0 %v1910_v24  ;;  %1739 = vmatpush3.bf16.msra.mxu1 %v1911_v16 }
 0x69f   :  { %1299 = vmatprep.subr.bf16.mxu0 %v1912_v17  ;;  %1740 = vmatprep.subr.bf16.mxu1 %v1981_v0 }
 0x6a0   :  { %1329 = vmatprep.mubr.bf16.mxu0 %v1982_v1  ;;  %1754 = vmatprep.mubr.msk.bf16.mxu1 %vm1983_vm0, %v1981_v0  ;;  %v1919_v1 = vld [vmem:[#allocation4 + $0x48] ss:$12 sps:$4 sm:$0xff]  }
 0x6a2   :  { %1300 = vmatpush1.bf16.msra.mxu0 %v1913_v18  ;;  %1741 = vmatpush3.bf16.msra.mxu1 %v1914_v19 }
 0x6a3   :  { %1301 = vmatprep.subr.bf16.mxu0 %v1915_v20  ;;  %1742 = vmatprep.subr.bf16.mxu1 %v1981_v0 }
 0x6a6   :  { %1302 = vmatpush1.bf16.msra.mxu0 %v1916_v21  ;;  %1743 = vmatpush3.bf16.msra.mxu1 %v1917_v22 }
 0x6a7   :  { %1303 = vmatprep.subr.bf16.mxu0 %v1918_v23  ;;  %1744 = vmatprep.subr.bf16.mxu1 %v1981_v0 }
 0x6aa   :  { %1304 = vmatpush1.bf16.msra.mxu0 %v1919_v1  ;;  %1745 = vmatpush3.bf16.msra.mxu1 %v1920_v27 }
 0x6ab   :  { %1305 = vmatprep.subr.bf16.mxu0 %v1921_v30  ;;  %1746 = vmatprep.subr.bf16.mxu1 %v1981_v0 }
 0x6ae   :  { %1306 = vmatpush1.bf16.msra.mxu0 %v1922_v50  ;;  %1747 = vmatpush3.bf16.msra.mxu1 %v2116_v45  ;;  %v1928_v45 = vld [vmem:[#allocation4 + $0xa8] ss:$12 sps:$4 sm:$0xff]  }
 0x6af   :  { %1307 = vmatprep.subr.bf16.mxu0 %v1923_v53  ;;  %1748 = vmatprep.subr.bf16.mxu1 %v1981_v0 }
 0x6b2   :  { %1308 = vmatpush1.bf16.msra.mxu0 %v1924_v55  ;;  %1749 = vmatpush3.bf16.msra.mxu1 %v2131_v49 }
 0x6b3   :  { %1309 = vmatprep.subr.bf16.mxu0 %v1925_v56  ;;  %1750 = vmatprep.subr.bf16.mxu1 %v1981_v0 }
 0x6b6   :  { %1310 = vmatpush1.bf16.msra.mxu0 %v1926_v58  ;;  %1751 = vmatpush3.bf16.msra.mxu1 %v2139_v51 }
 0x6b7   :  { %1311 = vmatprep.subr.bf16.mxu0 %v1927_v62  ;;  %1752 = vmatprep.subr.bf16.mxu1 %v1981_v0 }
 0x6ba   :  { %1312 = vmatpush1.bf16.msra.mxu0 %v1928_v45  ;;  %1753 = vmatpush3.bf16.msra.mxu1 %v2144_v52 }
 0x770   :  { %v1212_v59 = vpop.f32.mrb[28].mxu0  ;;  %v1253_v61 = vpop.f32.mrb[28].mxu1 }
 0x771   :  { %v1261_v26 = vrot.slane %v1212_v59, 2  ;;  %v1214_v49 = vpop.f32.mrb[29].mxu0  ;;  %v1736_v28 = vpop.f32.mrb[29].mxu1  ;;  %v1279_v40 = vadd.f32 %v1253_v61, %v2196_v25 }
 0x772   :  { %v1262_v29 = vrot.slane %v1214_v49, 2  ;;  %v1216_v31 = vpop.f32.mrb[30].mxu0  ;;  %v1256_v32 = vpop.f32.mrb[30].mxu1 }
 0x773   :  { %v1265_v33 = vadd.f32 %v1261_v26, %v2187_v6  ;;  %v1217_v34 = vpop.f32.mrb[31].mxu0  ;;  %v1737_v51 = vpop.f32.mrb[31].mxu1  ;;  %v1281_v41 = vrot.slane %v1279_v40, 2 }
 0x774   :  { %v1266_v35 = vadd.f32 %v1262_v29, %v2190_v10 }
 0x775   :  { %v1493_v36 = vmul.f32 -1.442695, %v1265_v33 }
 0x776   :  { %v1494_v0 = vmul.f32 -1.442695, %v1266_v35 }
 0x777   :  { %1889 = vpow2.f32 %v1493_v36 }
 0x778   :  { %1891 = vpow2.f32 %v1494_v0 }
 0x781   :  { %v1890_v37 = vpop.eup %1889 }
 0x782   :  { %v1892_v52 = vpop.eup %1891  ;;  %v1273_v38 = vadd.f32 1.0, %v1890_v37 }
 0x783   :  { %v1274_v39 = vadd.f32 1.0, %v1892_v52 }
 0x784   :  { %1893 = vrcp.f32 %v1273_v38 }
 0x785   :  { %1895 = vrcp.f32 %v1274_v39 }
 0x78e   :  { %v1894_v42 = vpop.eup %1893 }
 0x78f   :  { %v1896_v44 = vpop.eup %1895  ;;  %v1283_v46 = vmul.f32 %v1894_v42, %v1281_v41 }
 0x790   :  { %v1291_v47 = vmul.f32 %v1896_v44, %v1289_v43  ;;  %v1286_v63 = vsub.f32 1.0, %v1896_v44 }
 0x791   :  { %v1284_v48 = vadd.f32 %v1283_v46, %v2199_v54 }
 0x793   :  { %1897 = vtanh.f32 %v1284_v48 }
 0x79d   :  { %v1898_v2 = vpop.eup %1897 }
 0x79e   :  { %v1287_v60 = vmul.f32 %v1898_v2, %v1286_v63 }
 0x7a0   :  { %v1292_v57 = vadd.f32 %v1291_v47, %v1287_v60 }
 0x7a2   :  { %v1293_v3 = vpack.c.bf16 %v1292_v57, %v1292_v57  ;;  %v1423_v4 = vsel %vm1422_vm6, %v2441_v13, %v1292_v57  ;;  %v1408_v53 = vrot.slane %v1292_v57, 7 }
 0x7a4   :  { %v1295_v5 = vrot.slane %v1293_v3, 3 }
 0x7a6   :  { %1330 = vmatmul.mubr.bf16.vlgmr.msra.gmra.mrb[32].mxu0 %v1295_v5  ;;  %1755 = vmatmul.mubr.bf16.vlgmr.msra.gmra.mrb[32].mxu1 %v1295_v5 }
 0x879   :  { %v1331_v7 = vpop.f32.mrb[32].mxu0  ;;  %v1372_v8 = vpop.f32.mrb[32].mxu1 }
 0x87a   :  { %v1380_v9 = vrot.slane %v1331_v7, 1  ;;  %v1333_v11 = vpop.f32.mrb[33].mxu0  ;;  %v1756_v12 = vpop.f32.mrb[33].mxu1  ;;  %v1398_v27 = vadd.f32 %v1372_v8, %v2196_v25 }
 0x87b   :  { %v1381_v14 = vrot.slane %v1333_v11, 1  ;;  %v1335_v15 = vpop.f32.mrb[34].mxu0  ;;  %v1375_v24 = vpop.f32.mrb[34].mxu1 }
 0x87c   :  { %v1384_v16 = vadd.f32 %v1380_v9, %v2187_v6  ;;  %v1336_v17 = vpop.f32.mrb[35].mxu0  ;;  %v1757_v18 = vpop.f32.mrb[35].mxu1  ;;  %v1400_v30 = vrot.slane %v1398_v27, 1 }
 0x87d   :  { %v1385_v19 = vadd.f32 %v1381_v14, %v2190_v10 }
 0x87e   :  { %v1495_v20 = vmul.f32 -1.442695, %v1384_v16 }
 0x87f   :  { %v1496_v21 = vmul.f32 -1.442695, %v1385_v19 }
 0x880   :  { %1899 = vpow2.f32 %v1495_v20 }
 0x881   :  { %1901 = vpow2.f32 %v1496_v21 }
 0x88a   :  { %v1900_v13 = vpop.eup %1899 }
 0x88b   :  { %v1902_v22 = vpop.eup %1901  ;;  %v1392_v23 = vadd.f32 1.0, %v1900_v13 }
 0x88c   :  { %v1393_v1 = vadd.f32 1.0, %v1902_v22 }
 0x88d   :  { %1903 = vrcp.f32 %v1392_v23 }
 0x88e   :  { %1905 = vrcp.f32 %v1393_v1 }
 0x897   :  { %v1904_v50 = vpop.eup %1903 }
 0x898   :  { %v1906_v6 = vpop.eup %1905  ;;  %v1402_v55 = vmul.f32 %v1904_v50, %v1400_v30 }
 0x899   :  { %v1410_v56 = vmul.f32 %v1906_v6, %v1408_v53  ;;  %v1405_v58 = vsub.f32 1.0, %v1906_v6 }
 0x89a   :  { %v1403_v10 = vadd.f32 %v1402_v55, %v2199_v54 }
 0x89c   :  { %1907 = vtanh.f32 %v1403_v10 }
 0x8a6   :  { %v1908_v62 = vpop.eup %1907 }
 0x8a7   :  { %v1406_v45 = vmul.f32 %v1908_v62, %v1405_v58 }
 0x8a9   :  { %v1411_v59 = vadd.f32 %v1410_v56, %v1406_v45 }
 0x8ab   :  { %v1425_v61 = vsel %vm1424_vm7, %v1423_v4, %v1411_v59 }
 0x8ac   :  { %1426 = vst [vmem:[%s2476_s6] sm:$0xff] %v1425_v61 }
 0x8ad   :  { %1431 = vsyncpa [#allocation3], 1 }
 0x8ae   :  { %1432 = vsyncpa [#allocation5], 1 }

</bundles_post_ra>
